<compile_context>
chip_gen: v6e
topology: v6e:2x2x1
jax: 0.10.0
libtpu: 0.0.40
codegen_flags: <defaults>
</compile_context>

<pallas_src>
import jax
import jax.numpy as jnp
from jax import lax
from jax.experimental import pallas as pl
from jax.experimental.pallas import tpu as pltpu

D = 32            # input_dim == output_dim, num_fc_layers == 1
N_ATOM = 8
N_BOND = 8
LRELU_SLOPE = 0.01
BN_EPS = 1e-5
K_THR = int(N_ATOM * N_ATOM * 0.1)   # k = int(num_edges * 0.1) = 6 -> sorted_desc[6]


# ------------------------------ fused kernel ---------------------------------

def _gated_gcn_fused_kernel(
        hx_ref, ex_ref, u_ref,
        w_ade_ref, b_ade_ref,
        w_b_ref, b_b_ref,
        w_cfi_ref, b_cfi_ref,
        w_g_ref, b_g_ref,
        w_h_ref, b_h_ref,
        w_asrc_ref, w_adst_ref,
        g_e_ref, be_e_ref,
        g_h_ref, be_h_ref,
        t0_ref, t1_ref, s0_ref, s1_ref,
        out_main_ref, out_u_ref):
    f32 = jnp.float32
    hx = hx_ref[...]          # (2*N_ATOM, D)   rows: atoms then atom2
    ex = ex_ref[...]          # (2*N_BOND, D)   rows: bonds then bond2
    u = u_ref[...]            # (1, D)

    # ---- batched input linears: A/D/E on atoms, B on bonds, C/F/I on global ----
    ade = jnp.dot(hx, w_ade_ref[...], preferred_element_type=f32) + b_ade_ref[...]   # (16, 3D)
    be_all = jnp.dot(ex, w_b_ref[...], preferred_element_type=f32) + b_b_ref[...]    # (16, D)
    cfi = jnp.dot(u, w_cfi_ref[...], preferred_element_type=f32) + b_cfi_ref[...]    # (1, 3D)

    Ah, Dh, Eh = ade[:N_ATOM, 0:D], ade[:N_ATOM, D:2 * D], ade[:N_ATOM, 2 * D:3 * D]
    Ah2, Dh2, Eh2 = ade[N_ATOM:, 0:D], ade[N_ATOM:, D:2 * D], ade[N_ATOM:, 2 * D:3 * D]
    Be, Be2 = be_all[:N_BOND], be_all[N_BOND:]
    Cu, Fu, Iu = cfi[:, 0:D], cfi[:, D:2 * D], cfi[:, 2 * D:3 * D]

    t0, t1 = t0_ref[...], t1_ref[...]     # (N_BOND, N_ATOM) one-hot: bond -> atom0/atom1
    s0, s1 = s0_ref[...], s1_ref[...]     # (N_ATOM, N_BOND) one-hot: atom -> bond0/bond1
    m_a2b = t0 + t1                       # a2b adjacency (sum aggregation)

    g_e, be_e = g_e_ref[...], be_e_ref[...]
    g_h, be_h = g_h_ref[...], be_h_ref[...]

    # BatchNorm in training mode: per-call batch statistics, no running stats.
    def bn_relu(x, g, b):
        mu = jnp.mean(x, axis=0, keepdims=True)
        var = jnp.mean((x - mu) ** 2, axis=0, keepdims=True)
        xn = (x - mu) * lax.rsqrt(var + BN_EPS)
        return jnp.maximum(xn * g + b, 0.0)

    # ---- bond / bond2 update: sum_{a2b} Ah + Be (b2b) + Cu (g2b), BN + ReLU ----
    def bond_update(Ah_x, Be_x):
        agg = jnp.dot(m_a2b, Ah_x, preferred_element_type=f32) + Be_x + Cu
        return bn_relu(agg, g_e, be_e)

    e_new = bond_update(Ah, Be)
    e2_new = bond_update(Ah2, Be2)

    # ---- atom / atom2 update: Dh (a2a) + gated b2a reduction + Fu (g2a) ----
    def atom_update(Dh_x, Eh_x, e_x):
        # Gather neighbours via one-hot matmuls (in-VMEM, no HBM gathers):
        ehj0 = jnp.dot(t0, Eh_x, preferred_element_type=f32)   # Eh of bond's first atom
        ehj1 = jnp.dot(t1, Eh_x, preferred_element_type=f32)   # Eh of bond's second atom
        c00 = jnp.dot(s0, ehj0, preferred_element_type=f32)    # per-atom, bond0 candidates
        c01 = jnp.dot(s0, ehj1, preferred_element_type=f32)
        c10 = jnp.dot(s1, ehj0, preferred_element_type=f32)    # per-atom, bond1 candidates
        c11 = jnp.dot(s1, ehj1, preferred_element_type=f32)
        e0 = jnp.dot(s0, e_x, preferred_element_type=f32)      # updated bond feature (gate)
        e1 = jnp.dot(s1, e_x, preferred_element_type=f32)

        def sel_ne(ca, cb):  # select_not_equal: take ca if it differs from own Eh, else cb
            neq = jnp.any(ca != Eh_x, axis=-1, keepdims=True)
            return jnp.where(neq, ca, cb)

        sel0 = sel_ne(c00, c01)
        sel1 = sel_ne(c10, c11)
        sg0 = jax.nn.sigmoid(e0)
        sg1 = jax.nn.sigmoid(e1)
        inv = pl.reciprocal(sg0 + sg1 + 1e-6, approx=True)
        gated = (sg0 * sel0 + sg1 * sel1) * inv
        return Dh_x + gated + Fu

    h_pre = atom_update(Dh, Eh, e_new)
    h2_pre = atom_update(Dh2, Eh2, e2_new)

    # ---- u2v / v2u attention (dense bipartite atom <-> atom2) ----
    w_src = w_asrc_ref[...]   # (1, D)  attn weight on src Dh
    w_dst = w_adst_ref[...]   # (D, 1)  attn weight on dst Dh

    def lrelu(x):
        return jnp.where(x >= 0.0, x, LRELU_SLOPE * x)

    def scores(Dh_src, Dh_dst):
        a_dst = jnp.dot(Dh_dst, w_dst, preferred_element_type=f32)            # (Nd, 1)
        a_src = lax.dot_general(w_src, Dh_src, (((1,), (1,)), ((), ())),
                                preferred_element_type=f32)                   # (1, Ns)
        return lrelu(a_dst + a_src)                                           # (Nd, Ns)

    m_u2v = scores(Dh, Dh2)    # src = atom,  dst = atom2
    m_v2u = scores(Dh2, Dh)    # src = atom2, dst = atom

    # Global threshold: compute_global_alpha loops over ['u2v','v2u']; the surviving
    # threshold is sorted_desc(m_v2u.flatten())[k], k = int(64*0.1) = 6 — i.e. the
    # 7th-largest raw leaky-relu score. Selected in-kernel via 6 max+mask sweeps
    # (exact for distinct values; ties are removed as a group).
    cur = m_v2u
    for _ in range(K_THR):
        mx = jnp.max(jnp.max(cur, axis=1, keepdims=True), axis=0, keepdims=True)
        cur = jnp.where(cur >= mx, -jnp.inf, cur)
    thr = jnp.max(jnp.max(cur, axis=1, keepdims=True), axis=0, keepdims=True)  # (1, 1)

    def attn_mix(m, z_src, h_cur):
        # softmax over incoming edges, mask by global threshold (raw-score units,
        # faithfully reproducing the source model), renormalize, aggregate src Dh,
        # then h <- 0.8*h + 0.2*agg  (reduce_func1 + add)
        mmax = jnp.max(m, axis=1, keepdims=True)
        ex_ = jnp.exp(m - mmax)
        alpha = ex_ * pl.reciprocal(jnp.sum(ex_, axis=1, keepdims=True), approx=True)
        alpha = alpha * (alpha >= thr).astype(f32)
        asum = jnp.sum(alpha, axis=1, keepdims=True)
        no_msg = asum == 0.0
        any_zero = jnp.max(no_msg.astype(f32), axis=0, keepdims=True)  # torch guards ALL rows
        asum = asum + 1e-10 * any_zero
        alpha = alpha * pl.reciprocal(asum, approx=True)
        agg = jnp.dot(alpha, z_src, preferred_element_type=f32)
        agg = jnp.where(no_msg, h_cur, agg)
        return h_cur * 0.8 + agg * 0.2

    h2_mix = attn_mix(m_u2v, Dh, h2_pre)
    h_mix = attn_mix(m_v2u, Dh2, h_pre)

    # ---- BN + ReLU on atoms (shared bn_node_h params, batch stats per set) ----
    h_out = bn_relu(h_mix, g_h, be_h)
    h2_out = bn_relu(h2_mix, g_h, be_h)

    # ---- global update: mean(Gh)+mean(He)+mean(Gh2)+mean(He2)+Iu, ReLU ----
    # mean(x @ W + b) == mean(x) @ W + b (affine), so fold G/H into the means.
    mh = jnp.mean(h_out, axis=0, keepdims=True) + jnp.mean(h2_out, axis=0, keepdims=True)
    me = jnp.mean(e_new, axis=0, keepdims=True) + jnp.mean(e2_new, axis=0, keepdims=True)
    u_new = (jnp.dot(mh, w_g_ref[...], preferred_element_type=f32) + 2.0 * b_g_ref[...]
             + jnp.dot(me, w_h_ref[...], preferred_element_type=f32) + 2.0 * b_h_ref[...]
             + Iu)
    out_u_ref[...] = jnp.maximum(u_new, 0.0)   # bn_node_u skipped: u.shape[0] == 1

    # ---- lane-dense packed output slab: [h | h2 | e | e2]  ->  (8, 128) ----
    out_main_ref[...] = jnp.concatenate([h_out, h2_out, e_new, e2_new], axis=1)


# ------------------------------ parameters -----------------------------------

def init_params(key):
    def lin(k, din, dout):
        k1, k2 = jax.random.split(k)
        bound = 1.0 / (din ** 0.5)
        w = jax.random.uniform(k1, (din, dout), jnp.float32, -bound, bound)
        b = jax.random.uniform(k2, (1, dout), jnp.float32, -bound, bound)
        return w, b

    keys = jax.random.split(key, 10)
    params = {}
    for name, k in zip("ABCDEFGHI", keys[:9]):
        params[name] = lin(k, D, D)
    ab = 1.0 / (2 * D) ** 0.5
    params["attn"] = jax.random.uniform(keys[9], (2 * D, 1), jnp.float32, -ab, ab)
    params["bn_h"] = (jnp.ones((1, D), jnp.float32), jnp.zeros((1, D), jnp.float32))
    params["bn_e"] = (jnp.ones((1, D), jnp.float32), jnp.zeros((1, D), jnp.float32))
    # TODO(synk): self.w / self.z (LinearN(400, ...)) are defined in __init__ but never
    # used in forward(); they are omitted here.
    return params


# -------------------------------- forward ------------------------------------

@jax.jit
def gated_gcn_forward(params, feats, t0, t1, s0, s1):
    h, e = feats["atom"], feats["bond"]
    h2, e2 = feats["atom2"], feats["bond2"]
    u = feats["global"]

    hx = jnp.concatenate([h, h2], axis=0)      # (16, D)
    ex = jnp.concatenate([e, e2], axis=0)      # (16, D)

    w_ade = jnp.concatenate([params["A"][0], params["D"][0], params["E"][0]], axis=1)
    b_ade = jnp.concatenate([params["A"][1], params["D"][1], params["E"][1]], axis=1)
    w_cfi = jnp.concatenate([params["C"][0], params["F"][0], params["I"][0]], axis=1)
    b_cfi = jnp.concatenate([params["C"][1], params["F"][1], params["I"][1]], axis=1)
    w_b, b_b = params["B"]
    w_g, b_g = params["G"]
    w_h, b_h = params["H"]
    w_attn = params["attn"]                    # (2D, 1): [w_src ; w_dst]
    w_asrc = w_attn[:D, :].T                   # (1, D)
    w_adst = w_attn[D:, :]                     # (D, 1)
    g_h, be_h = params["bn_h"]
    g_e, be_e = params["bn_e"]

    vspec = pl.BlockSpec(memory_space=pltpu.MemorySpace.VMEM)
    args = (hx, ex, u,
            w_ade, b_ade, w_b, b_b, w_cfi, b_cfi,
            w_g, b_g, w_h, b_h,
            w_asrc, w_adst,
            g_e, be_e, g_h, be_h,
            t0, t1, s0, s1)

    out_main, u_out = pl.pallas_call(
        _gated_gcn_fused_kernel,
        out_shape=(jax.ShapeDtypeStruct((N_ATOM, 4 * D), jnp.float32),   # [h|h2|e|e2]
                   jax.ShapeDtypeStruct((1, D), jnp.float32)),
        in_specs=[vspec] * len(args),
        out_specs=(vspec, vspec),
    )(*args)

    h_out = out_main[:, 0:D]
    h2_out = out_main[:, D:2 * D]
    e_new = out_main[:, 2 * D:3 * D]
    e2_new = out_main[:, 3 * D:4 * D]

    # dropout=None -> Identity; residual=False; graph_norm=False
    return {"atom2": h2_out, "bond2": e2_new, "global": u_out,
            "atom": h_out, "bond": e_new}


# --------------------------------- main ---------------------------------------

if __name__ == "__main__":
    key = jax.random.PRNGKey(0)
    kp, kf = jax.random.split(key)
    params = init_params(kp)

    ks = jax.random.split(kf, 5)
    feats = {
        "atom":   jax.random.normal(ks[0], (N_ATOM, D), jnp.float32),
        "bond":   jax.random.normal(ks[1], (N_BOND, D), jnp.float32),
        "atom2":  jax.random.normal(ks[2], (N_ATOM, D), jnp.float32),
        "bond2":  jax.random.normal(ks[3], (N_BOND, D), jnp.float32),
        "global": jax.random.normal(ks[4], (1, D), jnp.float32),
    }

    # Fixed synthetic graph replacing the DGL heterograph: ring of 8 atoms / 8 bonds,
    # bond i connects atoms (i, (i+1) % N_ATOM); atom a sits on bonds ((a-1)%N, a);
    # single global node; self-loops for a2a/b2b/g2g; dense bipartite u2v / v2u.
    bond_atoms = jnp.stack(
        [jnp.arange(N_BOND), (jnp.arange(N_BOND) + 1) % N_ATOM], axis=1)
    atom_bonds = jnp.stack(
        [(jnp.arange(N_ATOM) - 1) % N_BOND, jnp.arange(N_ATOM)], axis=1)
    t0 = jax.nn.one_hot(bond_atoms[:, 0], N_ATOM, dtype=jnp.float32)   # (N_BOND, N_ATOM)
    t1 = jax.nn.one_hot(bond_atoms[:, 1], N_ATOM, dtype=jnp.float32)
    s0 = jax.nn.one_hot(atom_bonds[:, 0], N_BOND, dtype=jnp.float32)   # (N_ATOM, N_BOND)
    s1 = jax.nn.one_hot(atom_bonds[:, 1], N_BOND, dtype=jnp.float32)

    out = gated_gcn_forward(params, feats, t0, t1, s0, s1)
    jax.tree_util.tree_map(jax.block_until_ready, out)
    print("KERNEL_OK")
</pallas_src>

<mosaic_0001>
module attributes {stable_mosaic.version = 11 : i64} {
  func.func @_gated_gcn_fused_kernel(%arg0: memref<16x32xf32, #tpu.memory_space<vmem>>, %arg1: memref<16x32xf32, #tpu.memory_space<vmem>>, %arg2: memref<1x32xf32, #tpu.memory_space<vmem>>, %arg3: memref<32x96xf32, #tpu.memory_space<vmem>>, %arg4: memref<1x96xf32, #tpu.memory_space<vmem>>, %arg5: memref<32x32xf32, #tpu.memory_space<vmem>>, %arg6: memref<1x32xf32, #tpu.memory_space<vmem>>, %arg7: memref<32x96xf32, #tpu.memory_space<vmem>>, %arg8: memref<1x96xf32, #tpu.memory_space<vmem>>, %arg9: memref<32x32xf32, #tpu.memory_space<vmem>>, %arg10: memref<1x32xf32, #tpu.memory_space<vmem>>, %arg11: memref<32x32xf32, #tpu.memory_space<vmem>>, %arg12: memref<1x32xf32, #tpu.memory_space<vmem>>, %arg13: memref<1x32xf32, #tpu.memory_space<vmem>>, %arg14: memref<32x1xf32, #tpu.memory_space<vmem>>, %arg15: memref<1x32xf32, #tpu.memory_space<vmem>>, %arg16: memref<1x32xf32, #tpu.memory_space<vmem>>, %arg17: memref<1x32xf32, #tpu.memory_space<vmem>>, %arg18: memref<1x32xf32, #tpu.memory_space<vmem>>, %arg19: memref<8x8xf32, #tpu.memory_space<vmem>>, %arg20: memref<8x8xf32, #tpu.memory_space<vmem>>, %arg21: memref<8x8xf32, #tpu.memory_space<vmem>>, %arg22: memref<8x8xf32, #tpu.memory_space<vmem>>, %arg23: memref<8x128xf32, #tpu.memory_space<vmem>>, %arg24: memref<1x32xf32, #tpu.memory_space<vmem>>) attributes {dimension_semantics = [], scalar_prefetch = 0 : i64, scratch_operands = 0 : i64, tpu.core_type = #tpu.core_type<tc>} {
    %c0 = arith.constant 0 : index
    %c0_0 = arith.constant 0 : index
    %0 = vector.load %arg0[%c0, %c0_0] : memref<16x32xf32, #tpu.memory_space<vmem>>, vector<16x32xf32>
    %c0_1 = arith.constant 0 : index
    %c0_2 = arith.constant 0 : index
    %1 = vector.load %arg1[%c0_1, %c0_2] : memref<16x32xf32, #tpu.memory_space<vmem>>, vector<16x32xf32>
    %c0_3 = arith.constant 0 : index
    %c0_4 = arith.constant 0 : index
    %2 = vector.load %arg2[%c0_3, %c0_4] : memref<1x32xf32, #tpu.memory_space<vmem>>, vector<1x32xf32>
    %c0_5 = arith.constant 0 : index
    %c0_6 = arith.constant 0 : index
    %3 = vector.load %arg3[%c0_5, %c0_6] : memref<32x96xf32, #tpu.memory_space<vmem>>, vector<32x96xf32>
    %cst = arith.constant dense<0.000000e+00> : vector<16x96xf32>
    %4 = tpu.matmul %0, %3, %cst {dimension_numbers = #tpu.dot_dimension_numbers<[1], [0], [0], [1], [0, 0, 1, 1], [], []>} : vector<16x32xf32>, vector<32x96xf32>, vector<16x96xf32> -> vector<16x96xf32>
    %c0_7 = arith.constant 0 : index
    %c0_8 = arith.constant 0 : index
    %5 = vector.load %arg4[%c0_7, %c0_8] : memref<1x96xf32, #tpu.memory_space<vmem>>, vector<1x96xf32>
    %6 = vector.broadcast %5 : vector<1x96xf32> to vector<16x96xf32>
    %7 = arith.addf %4, %6 : vector<16x96xf32>
    %c0_9 = arith.constant 0 : index
    %c0_10 = arith.constant 0 : index
    %8 = vector.load %arg5[%c0_9, %c0_10] : memref<32x32xf32, #tpu.memory_space<vmem>>, vector<32x32xf32>
    %cst_11 = arith.constant dense<0.000000e+00> : vector<16x32xf32>
    %9 = tpu.matmul %1, %8, %cst_11 {dimension_numbers = #tpu.dot_dimension_numbers<[1], [0], [0], [1], [0, 0, 1, 1], [], []>} : vector<16x32xf32>, vector<32x32xf32>, vector<16x32xf32> -> vector<16x32xf32>
    %c0_12 = arith.constant 0 : index
    %c0_13 = arith.constant 0 : index
    %10 = vector.load %arg6[%c0_12, %c0_13] : memref<1x32xf32, #tpu.memory_space<vmem>>, vector<1x32xf32>
    %11 = vector.broadcast %10 : vector<1x32xf32> to vector<16x32xf32>
    %12 = arith.addf %9, %11 : vector<16x32xf32>
    %c0_14 = arith.constant 0 : index
    %c0_15 = arith.constant 0 : index
    %13 = vector.load %arg7[%c0_14, %c0_15] : memref<32x96xf32, #tpu.memory_space<vmem>>, vector<32x96xf32>
    %cst_16 = arith.constant dense<0.000000e+00> : vector<1x96xf32>
    %14 = tpu.matmul %2, %13, %cst_16 {dimension_numbers = #tpu.dot_dimension_numbers<[1], [0], [0], [1], [0, 0, 1, 1], [], []>} : vector<1x32xf32>, vector<32x96xf32>, vector<1x96xf32> -> vector<1x96xf32>
    %c0_17 = arith.constant 0 : index
    %c0_18 = arith.constant 0 : index
    %15 = vector.load %arg8[%c0_17, %c0_18] : memref<1x96xf32, #tpu.memory_space<vmem>>, vector<1x96xf32>
    %16 = arith.addf %14, %15 : vector<1x96xf32>
    %17 = vector.extract_strided_slice %7 {offsets = [0, 0], sizes = [8, 32], strides = [1, 1]} : vector<16x96xf32> to vector<8x32xf32>
    %18 = vector.extract_strided_slice %7 {offsets = [0, 32], sizes = [8, 32], strides = [1, 1]} : vector<16x96xf32> to vector<8x32xf32>
    %19 = vector.extract_strided_slice %7 {offsets = [0, 64], sizes = [8, 32], strides = [1, 1]} : vector<16x96xf32> to vector<8x32xf32>
    %20 = vector.extract_strided_slice %7 {offsets = [8, 0], sizes = [8, 32], strides = [1, 1]} : vector<16x96xf32> to vector<8x32xf32>
    %21 = vector.extract_strided_slice %7 {offsets = [8, 32], sizes = [8, 32], strides = [1, 1]} : vector<16x96xf32> to vector<8x32xf32>
    %22 = vector.extract_strided_slice %7 {offsets = [8, 64], sizes = [8, 32], strides = [1, 1]} : vector<16x96xf32> to vector<8x32xf32>
    %23 = vector.extract_strided_slice %12 {offsets = [0, 0], sizes = [8, 32], strides = [1, 1]} : vector<16x32xf32> to vector<8x32xf32>
    %24 = vector.extract_strided_slice %12 {offsets = [8, 0], sizes = [8, 32], strides = [1, 1]} : vector<16x32xf32> to vector<8x32xf32>
    %25 = vector.extract_strided_slice %16 {offsets = [0, 0], sizes = [1, 32], strides = [1, 1]} : vector<1x96xf32> to vector<1x32xf32>
    %26 = vector.extract_strided_slice %16 {offsets = [0, 32], sizes = [1, 32], strides = [1, 1]} : vector<1x96xf32> to vector<1x32xf32>
    %27 = vector.extract_strided_slice %16 {offsets = [0, 64], sizes = [1, 32], strides = [1, 1]} : vector<1x96xf32> to vector<1x32xf32>
    %c0_19 = arith.constant 0 : index
    %c0_20 = arith.constant 0 : index
    %28 = vector.load %arg19[%c0_19, %c0_20] : memref<8x8xf32, #tpu.memory_space<vmem>>, vector<8x8xf32>
    %c0_21 = arith.constant 0 : index
    %c0_22 = arith.constant 0 : index
    %29 = vector.load %arg20[%c0_21, %c0_22] : memref<8x8xf32, #tpu.memory_space<vmem>>, vector<8x8xf32>
    %c0_23 = arith.constant 0 : index
    %c0_24 = arith.constant 0 : index
    %30 = vector.load %arg21[%c0_23, %c0_24] : memref<8x8xf32, #tpu.memory_space<vmem>>, vector<8x8xf32>
    %c0_25 = arith.constant 0 : index
    %c0_26 = arith.constant 0 : index
    %31 = vector.load %arg22[%c0_25, %c0_26] : memref<8x8xf32, #tpu.memory_space<vmem>>, vector<8x8xf32>
    %32 = arith.addf %28, %29 : vector<8x8xf32>
    %c0_27 = arith.constant 0 : index
    %c0_28 = arith.constant 0 : index
    %33 = vector.load %arg15[%c0_27, %c0_28] : memref<1x32xf32, #tpu.memory_space<vmem>>, vector<1x32xf32>
    %c0_29 = arith.constant 0 : index
    %c0_30 = arith.constant 0 : index
    %34 = vector.load %arg16[%c0_29, %c0_30] : memref<1x32xf32, #tpu.memory_space<vmem>>, vector<1x32xf32>
    %c0_31 = arith.constant 0 : index
    %c0_32 = arith.constant 0 : index
    %35 = vector.load %arg17[%c0_31, %c0_32] : memref<1x32xf32, #tpu.memory_space<vmem>>, vector<1x32xf32>
    %c0_33 = arith.constant 0 : index
    %c0_34 = arith.constant 0 : index
    %36 = vector.load %arg18[%c0_33, %c0_34] : memref<1x32xf32, #tpu.memory_space<vmem>>, vector<1x32xf32>
    %cst_35 = arith.constant dense<0.000000e+00> : vector<8x32xf32>
    %37 = tpu.matmul %32, %17, %cst_35 {dimension_numbers = #tpu.dot_dimension_numbers<[1], [0], [0], [1], [0, 0, 1, 1], [], []>} : vector<8x8xf32>, vector<8x32xf32>, vector<8x32xf32> -> vector<8x32xf32>
    %38 = arith.addf %37, %23 : vector<8x32xf32>
    %39 = vector.broadcast %25 : vector<1x32xf32> to vector<8x32xf32>
    %40 = arith.addf %38, %39 : vector<8x32xf32>
    %cst_36 = arith.constant dense<0.000000e+00> : vector<32xf32>
    %41 = vector.multi_reduction <add>, %40, %cst_36 [0] : vector<8x32xf32> to vector<32xf32>
    %42 = vector.shape_cast %41 : vector<32xf32> to vector<1x32xf32>
    %cst_37 = arith.constant 8.000000e+00 : f32
    %43 = vector.broadcast %cst_37 : f32 to vector<1x32xf32>
    %44 = arith.divf %42, %43 : vector<1x32xf32>
    %45 = vector.broadcast %44 : vector<1x32xf32> to vector<8x32xf32>
    %46 = arith.subf %40, %45 : vector<8x32xf32>
    %47 = arith.mulf %46, %46 : vector<8x32xf32>
    %cst_38 = arith.constant dense<0.000000e+00> : vector<32xf32>
    %48 = vector.multi_reduction <add>, %47, %cst_38 [0] : vector<8x32xf32> to vector<32xf32>
    %49 = vector.shape_cast %48 : vector<32xf32> to vector<1x32xf32>
    %cst_39 = arith.constant 8.000000e+00 : f32
    %50 = vector.broadcast %cst_39 : f32 to vector<1x32xf32>
    %51 = arith.divf %49, %50 : vector<1x32xf32>
    %52 = vector.broadcast %44 : vector<1x32xf32> to vector<8x32xf32>
    %53 = arith.subf %40, %52 : vector<8x32xf32>
    %cst_40 = arith.constant 9.99999974E-6 : f32
    %54 = vector.broadcast %cst_40 : f32 to vector<1x32xf32>
    %55 = arith.addf %51, %54 : vector<1x32xf32>
    %56 = math.rsqrt %55 : vector<1x32xf32>
    %57 = vector.broadcast %56 : vector<1x32xf32> to vector<8x32xf32>
    %58 = arith.mulf %53, %57 : vector<8x32xf32>
    %59 = vector.broadcast %33 : vector<1x32xf32> to vector<8x32xf32>
    %60 = arith.mulf %58, %59 : vector<8x32xf32>
    %61 = vector.broadcast %34 : vector<1x32xf32> to vector<8x32xf32>
    %62 = arith.addf %60, %61 : vector<8x32xf32>
    %cst_41 = arith.constant 0.000000e+00 : f32
    %63 = vector.broadcast %cst_41 : f32 to vector<8x32xf32>
    %64 = arith.maximumf %62, %63 : vector<8x32xf32>
    %cst_42 = arith.constant dense<0.000000e+00> : vector<8x32xf32>
    %65 = tpu.matmul %32, %20, %cst_42 {dimension_numbers = #tpu.dot_dimension_numbers<[1], [0], [0], [1], [0, 0, 1, 1], [], []>} : vector<8x8xf32>, vector<8x32xf32>, vector<8x32xf32> -> vector<8x32xf32>
    %66 = arith.addf %65, %24 : vector<8x32xf32>
    %67 = vector.broadcast %25 : vector<1x32xf32> to vector<8x32xf32>
    %68 = arith.addf %66, %67 : vector<8x32xf32>
    %cst_43 = arith.constant dense<0.000000e+00> : vector<32xf32>
    %69 = vector.multi_reduction <add>, %68, %cst_43 [0] : vector<8x32xf32> to vector<32xf32>
    %70 = vector.shape_cast %69 : vector<32xf32> to vector<1x32xf32>
    %cst_44 = arith.constant 8.000000e+00 : f32
    %71 = vector.broadcast %cst_44 : f32 to vector<1x32xf32>
    %72 = arith.divf %70, %71 : vector<1x32xf32>
    %73 = vector.broadcast %72 : vector<1x32xf32> to vector<8x32xf32>
    %74 = arith.subf %68, %73 : vector<8x32xf32>
    %75 = arith.mulf %74, %74 : vector<8x32xf32>
    %cst_45 = arith.constant dense<0.000000e+00> : vector<32xf32>
    %76 = vector.multi_reduction <add>, %75, %cst_45 [0] : vector<8x32xf32> to vector<32xf32>
    %77 = vector.shape_cast %76 : vector<32xf32> to vector<1x32xf32>
    %cst_46 = arith.constant 8.000000e+00 : f32
    %78 = vector.broadcast %cst_46 : f32 to vector<1x32xf32>
    %79 = arith.divf %77, %78 : vector<1x32xf32>
    %80 = vector.broadcast %72 : vector<1x32xf32> to vector<8x32xf32>
    %81 = arith.subf %68, %80 : vector<8x32xf32>
    %cst_47 = arith.constant 9.99999974E-6 : f32
    %82 = vector.broadcast %cst_47 : f32 to vector<1x32xf32>
    %83 = arith.addf %79, %82 : vector<1x32xf32>
    %84 = math.rsqrt %83 : vector<1x32xf32>
    %85 = vector.broadcast %84 : vector<1x32xf32> to vector<8x32xf32>
    %86 = arith.mulf %81, %85 : vector<8x32xf32>
    %87 = vector.broadcast %33 : vector<1x32xf32> to vector<8x32xf32>
    %88 = arith.mulf %86, %87 : vector<8x32xf32>
    %89 = vector.broadcast %34 : vector<1x32xf32> to vector<8x32xf32>
    %90 = arith.addf %88, %89 : vector<8x32xf32>
    %cst_48 = arith.constant 0.000000e+00 : f32
    %91 = vector.broadcast %cst_48 : f32 to vector<8x32xf32>
    %92 = arith.maximumf %90, %91 : vector<8x32xf32>
    %cst_49 = arith.constant dense<0.000000e+00> : vector<8x32xf32>
    %93 = tpu.matmul %28, %19, %cst_49 {dimension_numbers = #tpu.dot_dimension_numbers<[1], [0], [0], [1], [0, 0, 1, 1], [], []>} : vector<8x8xf32>, vector<8x32xf32>, vector<8x32xf32> -> vector<8x32xf32>
    %cst_50 = arith.constant dense<0.000000e+00> : vector<8x32xf32>
    %94 = tpu.matmul %29, %19, %cst_50 {dimension_numbers = #tpu.dot_dimension_numbers<[1], [0], [0], [1], [0, 0, 1, 1], [], []>} : vector<8x8xf32>, vector<8x32xf32>, vector<8x32xf32> -> vector<8x32xf32>
    %cst_51 = arith.constant dense<0.000000e+00> : vector<8x32xf32>
    %95 = tpu.matmul %30, %93, %cst_51 {dimension_numbers = #tpu.dot_dimension_numbers<[1], [0], [0], [1], [0, 0, 1, 1], [], []>} : vector<8x8xf32>, vector<8x32xf32>, vector<8x32xf32> -> vector<8x32xf32>
    %cst_52 = arith.constant dense<0.000000e+00> : vector<8x32xf32>
    %96 = tpu.matmul %30, %94, %cst_52 {dimension_numbers = #tpu.dot_dimension_numbers<[1], [0], [0], [1], [0, 0, 1, 1], [], []>} : vector<8x8xf32>, vector<8x32xf32>, vector<8x32xf32> -> vector<8x32xf32>
    %cst_53 = arith.constant dense<0.000000e+00> : vector<8x32xf32>
    %97 = tpu.matmul %31, %93, %cst_53 {dimension_numbers = #tpu.dot_dimension_numbers<[1], [0], [0], [1], [0, 0, 1, 1], [], []>} : vector<8x8xf32>, vector<8x32xf32>, vector<8x32xf32> -> vector<8x32xf32>
    %cst_54 = arith.constant dense<0.000000e+00> : vector<8x32xf32>
    %98 = tpu.matmul %31, %94, %cst_54 {dimension_numbers = #tpu.dot_dimension_numbers<[1], [0], [0], [1], [0, 0, 1, 1], [], []>} : vector<8x8xf32>, vector<8x32xf32>, vector<8x32xf32> -> vector<8x32xf32>
    %cst_55 = arith.constant dense<0.000000e+00> : vector<8x32xf32>
    %99 = tpu.matmul %30, %64, %cst_55 {dimension_numbers = #tpu.dot_dimension_numbers<[1], [0], [0], [1], [0, 0, 1, 1], [], []>} : vector<8x8xf32>, vector<8x32xf32>, vector<8x32xf32> -> vector<8x32xf32>
    %cst_56 = arith.constant dense<0.000000e+00> : vector<8x32xf32>
    %100 = tpu.matmul %31, %64, %cst_56 {dimension_numbers = #tpu.dot_dimension_numbers<[1], [0], [0], [1], [0, 0, 1, 1], [], []>} : vector<8x8xf32>, vector<8x32xf32>, vector<8x32xf32> -> vector<8x32xf32>
    %101 = arith.cmpf one, %95, %19 : vector<8x32xf32>
    %cst_57 = arith.constant 1.000000e+00 : f32
    %cst_58 = arith.constant 0.000000e+00 : f32
    %102 = vector.broadcast %cst_57 : f32 to vector<8x32xf32>
    %103 = vector.broadcast %cst_58 : f32 to vector<8x32xf32>
    %104 = arith.select %101, %102, %103 : vector<8x32xi1>, vector<8x32xf32>
    %cst_59 = arith.constant dense<0xFF800000> : vector<8xf32>
    %105 = vector.multi_reduction <maximumf>, %104, %cst_59 [1] : vector<8x32xf32> to vector<8xf32>
    %cst_60 = arith.constant 0.000000e+00 : f32
    %106 = vector.broadcast %cst_60 : f32 to vector<8xf32>
    %107 = arith.cmpf ogt, %105, %106 : vector<8xf32>
    %108 = vector.shape_cast %107 : vector<8xi1> to vector<8x1xi1>
    %109 = vector.shape_cast %108 : vector<8x1xi1> to vector<8x1xi1>
    %110 = vector.broadcast %109 : vector<8x1xi1> to vector<8x32xi1>
    %111 = arith.select %110, %95, %96 : vector<8x32xi1>, vector<8x32xf32>
    %112 = arith.cmpf one, %97, %19 : vector<8x32xf32>
    %cst_61 = arith.constant 1.000000e+00 : f32
    %cst_62 = arith.constant 0.000000e+00 : f32
    %113 = vector.broadcast %cst_61 : f32 to vector<8x32xf32>
    %114 = vector.broadcast %cst_62 : f32 to vector<8x32xf32>
    %115 = arith.select %112, %113, %114 : vector<8x32xi1>, vector<8x32xf32>
    %cst_63 = arith.constant dense<0xFF800000> : vector<8xf32>
    %116 = vector.multi_reduction <maximumf>, %115, %cst_63 [1] : vector<8x32xf32> to vector<8xf32>
    %cst_64 = arith.constant 0.000000e+00 : f32
    %117 = vector.broadcast %cst_64 : f32 to vector<8xf32>
    %118 = arith.cmpf ogt, %116, %117 : vector<8xf32>
    %119 = vector.shape_cast %118 : vector<8xi1> to vector<8x1xi1>
    %120 = vector.shape_cast %119 : vector<8x1xi1> to vector<8x1xi1>
    %121 = vector.broadcast %120 : vector<8x1xi1> to vector<8x32xi1>
    %122 = arith.select %121, %97, %98 : vector<8x32xi1>, vector<8x32xf32>
    %123 = arith.negf %99 : vector<8x32xf32>
    %124 = math.exp %123 : vector<8x32xf32>
    %cst_65 = arith.constant 1.000000e+00 : f32
    %125 = vector.broadcast %cst_65 : f32 to vector<8x32xf32>
    %126 = arith.addf %125, %124 : vector<8x32xf32>
    %127 = arith.divf %125, %126 : vector<8x32xf32>
    %128 = arith.negf %100 : vector<8x32xf32>
    %129 = math.exp %128 : vector<8x32xf32>
    %cst_66 = arith.constant 1.000000e+00 : f32
    %130 = vector.broadcast %cst_66 : f32 to vector<8x32xf32>
    %131 = arith.addf %130, %129 : vector<8x32xf32>
    %132 = arith.divf %130, %131 : vector<8x32xf32>
    %133 = arith.addf %127, %132 : vector<8x32xf32>
    %cst_67 = arith.constant 9.99999997E-7 : f32
    %134 = vector.broadcast %cst_67 : f32 to vector<8x32xf32>
    %135 = arith.addf %133, %134 : vector<8x32xf32>
    %136 = tpu.reciprocal %135 {approx = true} : vector<8x32xf32> -> vector<8x32xf32>
    %137 = arith.mulf %127, %111 : vector<8x32xf32>
    %138 = arith.mulf %132, %122 : vector<8x32xf32>
    %139 = arith.addf %137, %138 : vector<8x32xf32>
    %140 = arith.mulf %139, %136 : vector<8x32xf32>
    %141 = arith.addf %18, %140 : vector<8x32xf32>
    %142 = vector.broadcast %26 : vector<1x32xf32> to vector<8x32xf32>
    %143 = arith.addf %141, %142 : vector<8x32xf32>
    %cst_68 = arith.constant dense<0.000000e+00> : vector<8x32xf32>
    %144 = tpu.matmul %28, %22, %cst_68 {dimension_numbers = #tpu.dot_dimension_numbers<[1], [0], [0], [1], [0, 0, 1, 1], [], []>} : vector<8x8xf32>, vector<8x32xf32>, vector<8x32xf32> -> vector<8x32xf32>
    %cst_69 = arith.constant dense<0.000000e+00> : vector<8x32xf32>
    %145 = tpu.matmul %29, %22, %cst_69 {dimension_numbers = #tpu.dot_dimension_numbers<[1], [0], [0], [1], [0, 0, 1, 1], [], []>} : vector<8x8xf32>, vector<8x32xf32>, vector<8x32xf32> -> vector<8x32xf32>
    %cst_70 = arith.constant dense<0.000000e+00> : vector<8x32xf32>
    %146 = tpu.matmul %30, %144, %cst_70 {dimension_numbers = #tpu.dot_dimension_numbers<[1], [0], [0], [1], [0, 0, 1, 1], [], []>} : vector<8x8xf32>, vector<8x32xf32>, vector<8x32xf32> -> vector<8x32xf32>
    %cst_71 = arith.constant dense<0.000000e+00> : vector<8x32xf32>
    %147 = tpu.matmul %30, %145, %cst_71 {dimension_numbers = #tpu.dot_dimension_numbers<[1], [0], [0], [1], [0, 0, 1, 1], [], []>} : vector<8x8xf32>, vector<8x32xf32>, vector<8x32xf32> -> vector<8x32xf32>
    %cst_72 = arith.constant dense<0.000000e+00> : vector<8x32xf32>
    %148 = tpu.matmul %31, %144, %cst_72 {dimension_numbers = #tpu.dot_dimension_numbers<[1], [0], [0], [1], [0, 0, 1, 1], [], []>} : vector<8x8xf32>, vector<8x32xf32>, vector<8x32xf32> -> vector<8x32xf32>
    %cst_73 = arith.constant dense<0.000000e+00> : vector<8x32xf32>
    %149 = tpu.matmul %31, %145, %cst_73 {dimension_numbers = #tpu.dot_dimension_numbers<[1], [0], [0], [1], [0, 0, 1, 1], [], []>} : vector<8x8xf32>, vector<8x32xf32>, vector<8x32xf32> -> vector<8x32xf32>
    %cst_74 = arith.constant dense<0.000000e+00> : vector<8x32xf32>
    %150 = tpu.matmul %30, %92, %cst_74 {dimension_numbers = #tpu.dot_dimension_numbers<[1], [0], [0], [1], [0, 0, 1, 1], [], []>} : vector<8x8xf32>, vector<8x32xf32>, vector<8x32xf32> -> vector<8x32xf32>
    %cst_75 = arith.constant dense<0.000000e+00> : vector<8x32xf32>
    %151 = tpu.matmul %31, %92, %cst_75 {dimension_numbers = #tpu.dot_dimension_numbers<[1], [0], [0], [1], [0, 0, 1, 1], [], []>} : vector<8x8xf32>, vector<8x32xf32>, vector<8x32xf32> -> vector<8x32xf32>
    %152 = arith.cmpf one, %146, %22 : vector<8x32xf32>
    %cst_76 = arith.constant 1.000000e+00 : f32
    %cst_77 = arith.constant 0.000000e+00 : f32
    %153 = vector.broadcast %cst_76 : f32 to vector<8x32xf32>
    %154 = vector.broadcast %cst_77 : f32 to vector<8x32xf32>
    %155 = arith.select %152, %153, %154 : vector<8x32xi1>, vector<8x32xf32>
    %cst_78 = arith.constant dense<0xFF800000> : vector<8xf32>
    %156 = vector.multi_reduction <maximumf>, %155, %cst_78 [1] : vector<8x32xf32> to vector<8xf32>
    %cst_79 = arith.constant 0.000000e+00 : f32
    %157 = vector.broadcast %cst_79 : f32 to vector<8xf32>
    %158 = arith.cmpf ogt, %156, %157 : vector<8xf32>
    %159 = vector.shape_cast %158 : vector<8xi1> to vector<8x1xi1>
    %160 = vector.shape_cast %159 : vector<8x1xi1> to vector<8x1xi1>
    %161 = vector.broadcast %160 : vector<8x1xi1> to vector<8x32xi1>
    %162 = arith.select %161, %146, %147 : vector<8x32xi1>, vector<8x32xf32>
    %163 = arith.cmpf one, %148, %22 : vector<8x32xf32>
    %cst_80 = arith.constant 1.000000e+00 : f32
    %cst_81 = arith.constant 0.000000e+00 : f32
    %164 = vector.broadcast %cst_80 : f32 to vector<8x32xf32>
    %165 = vector.broadcast %cst_81 : f32 to vector<8x32xf32>
    %166 = arith.select %163, %164, %165 : vector<8x32xi1>, vector<8x32xf32>
    %cst_82 = arith.constant dense<0xFF800000> : vector<8xf32>
    %167 = vector.multi_reduction <maximumf>, %166, %cst_82 [1] : vector<8x32xf32> to vector<8xf32>
    %cst_83 = arith.constant 0.000000e+00 : f32
    %168 = vector.broadcast %cst_83 : f32 to vector<8xf32>
    %169 = arith.cmpf ogt, %167, %168 : vector<8xf32>
    %170 = vector.shape_cast %169 : vector<8xi1> to vector<8x1xi1>
    %171 = vector.shape_cast %170 : vector<8x1xi1> to vector<8x1xi1>
    %172 = vector.broadcast %171 : vector<8x1xi1> to vector<8x32xi1>
    %173 = arith.select %172, %148, %149 : vector<8x32xi1>, vector<8x32xf32>
    %174 = arith.negf %150 : vector<8x32xf32>
    %175 = math.exp %174 : vector<8x32xf32>
    %cst_84 = arith.constant 1.000000e+00 : f32
    %176 = vector.broadcast %cst_84 : f32 to vector<8x32xf32>
    %177 = arith.addf %176, %175 : vector<8x32xf32>
    %178 = arith.divf %176, %177 : vector<8x32xf32>
    %179 = arith.negf %151 : vector<8x32xf32>
    %180 = math.exp %179 : vector<8x32xf32>
    %cst_85 = arith.constant 1.000000e+00 : f32
    %181 = vector.broadcast %cst_85 : f32 to vector<8x32xf32>
    %182 = arith.addf %181, %180 : vector<8x32xf32>
    %183 = arith.divf %181, %182 : vector<8x32xf32>
    %184 = arith.addf %178, %183 : vector<8x32xf32>
    %cst_86 = arith.constant 9.99999997E-7 : f32
    %185 = vector.broadcast %cst_86 : f32 to vector<8x32xf32>
    %186 = arith.addf %184, %185 : vector<8x32xf32>
    %187 = tpu.reciprocal %186 {approx = true} : vector<8x32xf32> -> vector<8x32xf32>
    %188 = arith.mulf %178, %162 : vector<8x32xf32>
    %189 = arith.mulf %183, %173 : vector<8x32xf32>
    %190 = arith.addf %188, %189 : vector<8x32xf32>
    %191 = arith.mulf %190, %187 : vector<8x32xf32>
    %192 = arith.addf %21, %191 : vector<8x32xf32>
    %193 = vector.broadcast %26 : vector<1x32xf32> to vector<8x32xf32>
    %194 = arith.addf %192, %193 : vector<8x32xf32>
    %c0_87 = arith.constant 0 : index
    %c0_88 = arith.constant 0 : index
    %195 = vector.load %arg13[%c0_87, %c0_88] : memref<1x32xf32, #tpu.memory_space<vmem>>, vector<1x32xf32>
    %c0_89 = arith.constant 0 : index
    %c0_90 = arith.constant 0 : index
    %196 = vector.load %arg14[%c0_89, %c0_90] : memref<32x1xf32, #tpu.memory_space<vmem>>, vector<32x1xf32>
    %cst_91 = arith.constant dense<0.000000e+00> : vector<8x1xf32>
    %197 = tpu.matmul %21, %196, %cst_91 {dimension_numbers = #tpu.dot_dimension_numbers<[1], [0], [0], [1], [0, 0, 1, 1], [], []>} : vector<8x32xf32>, vector<32x1xf32>, vector<8x1xf32> -> vector<8x1xf32>
    %cst_92 = arith.constant dense<0.000000e+00> : vector<1x8xf32>
    %198 = tpu.matmul %195, %18, %cst_92 {dimension_numbers = #tpu.dot_dimension_numbers<[1], [1], [0], [0], [0, 0, 1, 0], [], []>} : vector<1x32xf32>, vector<8x32xf32>, vector<1x8xf32> -> vector<1x8xf32>
    %199 = vector.broadcast %197 : vector<8x1xf32> to vector<8x8xf32>
    %200 = vector.broadcast %198 : vector<1x8xf32> to vector<8x8xf32>
    %201 = arith.addf %199, %200 : vector<8x8xf32>
    %cst_93 = arith.constant 0.000000e+00 : f32
    %202 = vector.broadcast %cst_93 : f32 to vector<8x8xf32>
    %203 = arith.cmpf oge, %201, %202 : vector<8x8xf32>
    %cst_94 = arith.constant 0.00999999977 : f32
    %204 = vector.broadcast %cst_94 : f32 to vector<8x8xf32>
    %205 = arith.mulf %204, %201 : vector<8x8xf32>
    %206 = arith.select %203, %201, %205 : vector<8x8xi1>, vector<8x8xf32>
    %cst_95 = arith.constant dense<0.000000e+00> : vector<8x1xf32>
    %207 = tpu.matmul %18, %196, %cst_95 {dimension_numbers = #tpu.dot_dimension_numbers<[1], [0], [0], [1], [0, 0, 1, 1], [], []>} : vector<8x32xf32>, vector<32x1xf32>, vector<8x1xf32> -> vector<8x1xf32>
    %cst_96 = arith.constant dense<0.000000e+00> : vector<1x8xf32>
    %208 = tpu.matmul %195, %21, %cst_96 {dimension_numbers = #tpu.dot_dimension_numbers<[1], [1], [0], [0], [0, 0, 1, 0], [], []>} : vector<1x32xf32>, vector<8x32xf32>, vector<1x8xf32> -> vector<1x8xf32>
    %209 = vector.broadcast %207 : vector<8x1xf32> to vector<8x8xf32>
    %210 = vector.broadcast %208 : vector<1x8xf32> to vector<8x8xf32>
    %211 = arith.addf %209, %210 : vector<8x8xf32>
    %cst_97 = arith.constant 0.000000e+00 : f32
    %212 = vector.broadcast %cst_97 : f32 to vector<8x8xf32>
    %213 = arith.cmpf oge, %211, %212 : vector<8x8xf32>
    %cst_98 = arith.constant 0.00999999977 : f32
    %214 = vector.broadcast %cst_98 : f32 to vector<8x8xf32>
    %215 = arith.mulf %214, %211 : vector<8x8xf32>
    %216 = arith.select %213, %211, %215 : vector<8x8xi1>, vector<8x8xf32>
    %cst_99 = arith.constant dense<0xFF800000> : vector<8xf32>
    %217 = vector.multi_reduction <maximumf>, %216, %cst_99 [1] : vector<8x8xf32> to vector<8xf32>
    %218 = vector.shape_cast %217 : vector<8xf32> to vector<8x1xf32>
    %cst_100 = arith.constant dense<0xFF800000> : vector<1xf32>
    %219 = vector.multi_reduction <maximumf>, %218, %cst_100 [0] : vector<8x1xf32> to vector<1xf32>
    %220 = vector.shape_cast %219 : vector<1xf32> to vector<1x1xf32>
    %221 = vector.broadcast %220 : vector<1x1xf32> to vector<8x8xf32>
    %222 = arith.cmpf oge, %216, %221 : vector<8x8xf32>
    %cst_101 = arith.constant 0xFF800000 : f32
    %223 = vector.broadcast %cst_101 : f32 to vector<8x8xf32>
    %224 = arith.select %222, %223, %216 : vector<8x8xi1>, vector<8x8xf32>
    %cst_102 = arith.constant dense<0xFF800000> : vector<8xf32>
    %225 = vector.multi_reduction <maximumf>, %224, %cst_102 [1] : vector<8x8xf32> to vector<8xf32>
    %226 = vector.shape_cast %225 : vector<8xf32> to vector<8x1xf32>
    %cst_103 = arith.constant dense<0xFF800000> : vector<1xf32>
    %227 = vector.multi_reduction <maximumf>, %226, %cst_103 [0] : vector<8x1xf32> to vector<1xf32>
    %228 = vector.shape_cast %227 : vector<1xf32> to vector<1x1xf32>
    %229 = vector.broadcast %228 : vector<1x1xf32> to vector<8x8xf32>
    %230 = arith.cmpf oge, %224, %229 : vector<8x8xf32>
    %cst_104 = arith.constant 0xFF800000 : f32
    %231 = vector.broadcast %cst_104 : f32 to vector<8x8xf32>
    %232 = arith.select %230, %231, %224 : vector<8x8xi1>, vector<8x8xf32>
    %cst_105 = arith.constant dense<0xFF800000> : vector<8xf32>
    %233 = vector.multi_reduction <maximumf>, %232, %cst_105 [1] : vector<8x8xf32> to vector<8xf32>
    %234 = vector.shape_cast %233 : vector<8xf32> to vector<8x1xf32>
    %cst_106 = arith.constant dense<0xFF800000> : vector<1xf32>
    %235 = vector.multi_reduction <maximumf>, %234, %cst_106 [0] : vector<8x1xf32> to vector<1xf32>
    %236 = vector.shape_cast %235 : vector<1xf32> to vector<1x1xf32>
    %237 = vector.broadcast %236 : vector<1x1xf32> to vector<8x8xf32>
    %238 = arith.cmpf oge, %232, %237 : vector<8x8xf32>
    %cst_107 = arith.constant 0xFF800000 : f32
    %239 = vector.broadcast %cst_107 : f32 to vector<8x8xf32>
    %240 = arith.select %238, %239, %232 : vector<8x8xi1>, vector<8x8xf32>
    %cst_108 = arith.constant dense<0xFF800000> : vector<8xf32>
    %241 = vector.multi_reduction <maximumf>, %240, %cst_108 [1] : vector<8x8xf32> to vector<8xf32>
    %242 = vector.shape_cast %241 : vector<8xf32> to vector<8x1xf32>
    %cst_109 = arith.constant dense<0xFF800000> : vector<1xf32>
    %243 = vector.multi_reduction <maximumf>, %242, %cst_109 [0] : vector<8x1xf32> to vector<1xf32>
    %244 = vector.shape_cast %243 : vector<1xf32> to vector<1x1xf32>
    %245 = vector.broadcast %244 : vector<1x1xf32> to vector<8x8xf32>
    %246 = arith.cmpf oge, %240, %245 : vector<8x8xf32>
    %cst_110 = arith.constant 0xFF800000 : f32
    %247 = vector.broadcast %cst_110 : f32 to vector<8x8xf32>
    %248 = arith.select %246, %247, %240 : vector<8x8xi1>, vector<8x8xf32>
    %cst_111 = arith.constant dense<0xFF800000> : vector<8xf32>
    %249 = vector.multi_reduction <maximumf>, %248, %cst_111 [1] : vector<8x8xf32> to vector<8xf32>
    %250 = vector.shape_cast %249 : vector<8xf32> to vector<8x1xf32>
    %cst_112 = arith.constant dense<0xFF800000> : vector<1xf32>
    %251 = vector.multi_reduction <maximumf>, %250, %cst_112 [0] : vector<8x1xf32> to vector<1xf32>
    %252 = vector.shape_cast %251 : vector<1xf32> to vector<1x1xf32>
    %253 = vector.broadcast %252 : vector<1x1xf32> to vector<8x8xf32>
    %254 = arith.cmpf oge, %248, %253 : vector<8x8xf32>
    %cst_113 = arith.constant 0xFF800000 : f32
    %255 = vector.broadcast %cst_113 : f32 to vector<8x8xf32>
    %256 = arith.select %254, %255, %248 : vector<8x8xi1>, vector<8x8xf32>
    %cst_114 = arith.constant dense<0xFF800000> : vector<8xf32>
    %257 = vector.multi_reduction <maximumf>, %256, %cst_114 [1] : vector<8x8xf32> to vector<8xf32>
    %258 = vector.shape_cast %257 : vector<8xf32> to vector<8x1xf32>
    %cst_115 = arith.constant dense<0xFF800000> : vector<1xf32>
    %259 = vector.multi_reduction <maximumf>, %258, %cst_115 [0] : vector<8x1xf32> to vector<1xf32>
    %260 = vector.shape_cast %259 : vector<1xf32> to vector<1x1xf32>
    %261 = vector.broadcast %260 : vector<1x1xf32> to vector<8x8xf32>
    %262 = arith.cmpf oge, %256, %261 : vector<8x8xf32>
    %cst_116 = arith.constant 0xFF800000 : f32
    %263 = vector.broadcast %cst_116 : f32 to vector<8x8xf32>
    %264 = arith.select %262, %263, %256 : vector<8x8xi1>, vector<8x8xf32>
    %cst_117 = arith.constant dense<0xFF800000> : vector<8xf32>
    %265 = vector.multi_reduction <maximumf>, %264, %cst_117 [1] : vector<8x8xf32> to vector<8xf32>
    %266 = vector.shape_cast %265 : vector<8xf32> to vector<8x1xf32>
    %cst_118 = arith.constant dense<0xFF800000> : vector<1xf32>
    %267 = vector.multi_reduction <maximumf>, %266, %cst_118 [0] : vector<8x1xf32> to vector<1xf32>
    %268 = vector.shape_cast %267 : vector<1xf32> to vector<1x1xf32>
    %cst_119 = arith.constant dense<0xFF800000> : vector<8xf32>
    %269 = vector.multi_reduction <maximumf>, %206, %cst_119 [1] : vector<8x8xf32> to vector<8xf32>
    %270 = vector.shape_cast %269 : vector<8xf32> to vector<8x1xf32>
    %271 = vector.broadcast %270 : vector<8x1xf32> to vector<8x8xf32>
    %272 = arith.subf %206, %271 : vector<8x8xf32>
    %273 = math.exp %272 : vector<8x8xf32>
    %cst_120 = arith.constant dense<0.000000e+00> : vector<8xf32>
    %274 = vector.multi_reduction <add>, %273, %cst_120 [1] : vector<8x8xf32> to vector<8xf32>
    %275 = vector.shape_cast %274 : vector<8xf32> to vector<8x1xf32>
    %276 = tpu.reciprocal %275 {approx = true} : vector<8x1xf32> -> vector<8x1xf32>
    %277 = vector.broadcast %276 : vector<8x1xf32> to vector<8x8xf32>
    %278 = arith.mulf %273, %277 : vector<8x8xf32>
    %279 = vector.broadcast %268 : vector<1x1xf32> to vector<8x8xf32>
    %280 = arith.cmpf oge, %278, %279 : vector<8x8xf32>
    %281 = arith.extui %280 : vector<8x8xi1> to vector<8x8xi32>
    %282 = arith.sitofp %281 : vector<8x8xi32> to vector<8x8xf32>
    %283 = arith.mulf %278, %282 : vector<8x8xf32>
    %cst_121 = arith.constant dense<0.000000e+00> : vector<8xf32>
    %284 = vector.multi_reduction <add>, %283, %cst_121 [1] : vector<8x8xf32> to vector<8xf32>
    %285 = vector.shape_cast %284 : vector<8xf32> to vector<8x1xf32>
    %cst_122 = arith.constant 0.000000e+00 : f32
    %286 = vector.broadcast %cst_122 : f32 to vector<8x1xf32>
    %287 = arith.cmpf oeq, %285, %286 : vector<8x1xf32>
    %288 = arith.extui %287 : vector<8x1xi1> to vector<8x1xi32>
    %289 = arith.sitofp %288 : vector<8x1xi32> to vector<8x1xf32>
    %cst_123 = arith.constant dense<0xFF800000> : vector<1xf32>
    %290 = vector.multi_reduction <maximumf>, %289, %cst_123 [0] : vector<8x1xf32> to vector<1xf32>
    %291 = vector.shape_cast %290 : vector<1xf32> to vector<1x1xf32>
    %cst_124 = arith.constant 1.000000e-10 : f32
    %292 = vector.broadcast %cst_124 : f32 to vector<1x1xf32>
    %293 = arith.mulf %292, %291 : vector<1x1xf32>
    %294 = vector.broadcast %293 : vector<1x1xf32> to vector<8x1xf32>
    %295 = arith.addf %285, %294 : vector<8x1xf32>
    %296 = tpu.reciprocal %295 {approx = true} : vector<8x1xf32> -> vector<8x1xf32>
    %297 = vector.broadcast %296 : vector<8x1xf32> to vector<8x8xf32>
    %298 = arith.mulf %283, %297 : vector<8x8xf32>
    %cst_125 = arith.constant dense<0.000000e+00> : vector<8x32xf32>
    %299 = tpu.matmul %298, %18, %cst_125 {dimension_numbers = #tpu.dot_dimension_numbers<[1], [0], [0], [1], [0, 0, 1, 1], [], []>} : vector<8x8xf32>, vector<8x32xf32>, vector<8x32xf32> -> vector<8x32xf32>
    %300 = vector.shape_cast %287 : vector<8x1xi1> to vector<8x1xi1>
    %301 = vector.broadcast %300 : vector<8x1xi1> to vector<8x32xi1>
    %302 = arith.select %301, %194, %299 : vector<8x32xi1>, vector<8x32xf32>
    %cst_126 = arith.constant 8.000000e-01 : f32
    %303 = vector.broadcast %cst_126 : f32 to vector<8x32xf32>
    %304 = arith.mulf %194, %303 : vector<8x32xf32>
    %cst_127 = arith.constant 2.000000e-01 : f32
    %305 = vector.broadcast %cst_127 : f32 to vector<8x32xf32>
    %306 = arith.mulf %302, %305 : vector<8x32xf32>
    %307 = arith.addf %304, %306 : vector<8x32xf32>
    %cst_128 = arith.constant dense<0xFF800000> : vector<8xf32>
    %308 = vector.multi_reduction <maximumf>, %216, %cst_128 [1] : vector<8x8xf32> to vector<8xf32>
    %309 = vector.shape_cast %308 : vector<8xf32> to vector<8x1xf32>
    %310 = vector.broadcast %309 : vector<8x1xf32> to vector<8x8xf32>
    %311 = arith.subf %216, %310 : vector<8x8xf32>
    %312 = math.exp %311 : vector<8x8xf32>
    %cst_129 = arith.constant dense<0.000000e+00> : vector<8xf32>
    %313 = vector.multi_reduction <add>, %312, %cst_129 [1] : vector<8x8xf32> to vector<8xf32>
    %314 = vector.shape_cast %313 : vector<8xf32> to vector<8x1xf32>
    %315 = tpu.reciprocal %314 {approx = true} : vector<8x1xf32> -> vector<8x1xf32>
    %316 = vector.broadcast %315 : vector<8x1xf32> to vector<8x8xf32>
    %317 = arith.mulf %312, %316 : vector<8x8xf32>
    %318 = vector.broadcast %268 : vector<1x1xf32> to vector<8x8xf32>
    %319 = arith.cmpf oge, %317, %318 : vector<8x8xf32>
    %320 = arith.extui %319 : vector<8x8xi1> to vector<8x8xi32>
    %321 = arith.sitofp %320 : vector<8x8xi32> to vector<8x8xf32>
    %322 = arith.mulf %317, %321 : vector<8x8xf32>
    %cst_130 = arith.constant dense<0.000000e+00> : vector<8xf32>
    %323 = vector.multi_reduction <add>, %322, %cst_130 [1] : vector<8x8xf32> to vector<8xf32>
    %324 = vector.shape_cast %323 : vector<8xf32> to vector<8x1xf32>
    %cst_131 = arith.constant 0.000000e+00 : f32
    %325 = vector.broadcast %cst_131 : f32 to vector<8x1xf32>
    %326 = arith.cmpf oeq, %324, %325 : vector<8x1xf32>
    %327 = arith.extui %326 : vector<8x1xi1> to vector<8x1xi32>
    %328 = arith.sitofp %327 : vector<8x1xi32> to vector<8x1xf32>
    %cst_132 = arith.constant dense<0xFF800000> : vector<1xf32>
    %329 = vector.multi_reduction <maximumf>, %328, %cst_132 [0] : vector<8x1xf32> to vector<1xf32>
    %330 = vector.shape_cast %329 : vector<1xf32> to vector<1x1xf32>
    %cst_133 = arith.constant 1.000000e-10 : f32
    %331 = vector.broadcast %cst_133 : f32 to vector<1x1xf32>
    %332 = arith.mulf %331, %330 : vector<1x1xf32>
    %333 = vector.broadcast %332 : vector<1x1xf32> to vector<8x1xf32>
    %334 = arith.addf %324, %333 : vector<8x1xf32>
    %335 = tpu.reciprocal %334 {approx = true} : vector<8x1xf32> -> vector<8x1xf32>
    %336 = vector.broadcast %335 : vector<8x1xf32> to vector<8x8xf32>
    %337 = arith.mulf %322, %336 : vector<8x8xf32>
    %cst_134 = arith.constant dense<0.000000e+00> : vector<8x32xf32>
    %338 = tpu.matmul %337, %21, %cst_134 {dimension_numbers = #tpu.dot_dimension_numbers<[1], [0], [0], [1], [0, 0, 1, 1], [], []>} : vector<8x8xf32>, vector<8x32xf32>, vector<8x32xf32> -> vector<8x32xf32>
    %339 = vector.shape_cast %326 : vector<8x1xi1> to vector<8x1xi1>
    %340 = vector.broadcast %339 : vector<8x1xi1> to vector<8x32xi1>
    %341 = arith.select %340, %143, %338 : vector<8x32xi1>, vector<8x32xf32>
    %cst_135 = arith.constant 8.000000e-01 : f32
    %342 = vector.broadcast %cst_135 : f32 to vector<8x32xf32>
    %343 = arith.mulf %143, %342 : vector<8x32xf32>
    %cst_136 = arith.constant 2.000000e-01 : f32
    %344 = vector.broadcast %cst_136 : f32 to vector<8x32xf32>
    %345 = arith.mulf %341, %344 : vector<8x32xf32>
    %346 = arith.addf %343, %345 : vector<8x32xf32>
    %cst_137 = arith.constant dense<0.000000e+00> : vector<32xf32>
    %347 = vector.multi_reduction <add>, %346, %cst_137 [0] : vector<8x32xf32> to vector<32xf32>
    %348 = vector.shape_cast %347 : vector<32xf32> to vector<1x32xf32>
    %cst_138 = arith.constant 8.000000e+00 : f32
    %349 = vector.broadcast %cst_138 : f32 to vector<1x32xf32>
    %350 = arith.divf %348, %349 : vector<1x32xf32>
    %351 = vector.broadcast %350 : vector<1x32xf32> to vector<8x32xf32>
    %352 = arith.subf %346, %351 : vector<8x32xf32>
    %353 = arith.mulf %352, %352 : vector<8x32xf32>
    %cst_139 = arith.constant dense<0.000000e+00> : vector<32xf32>
    %354 = vector.multi_reduction <add>, %353, %cst_139 [0] : vector<8x32xf32> to vector<32xf32>
    %355 = vector.shape_cast %354 : vector<32xf32> to vector<1x32xf32>
    %cst_140 = arith.constant 8.000000e+00 : f32
    %356 = vector.broadcast %cst_140 : f32 to vector<1x32xf32>
    %357 = arith.divf %355, %356 : vector<1x32xf32>
    %358 = vector.broadcast %350 : vector<1x32xf32> to vector<8x32xf32>
    %359 = arith.subf %346, %358 : vector<8x32xf32>
    %cst_141 = arith.constant 9.99999974E-6 : f32
    %360 = vector.broadcast %cst_141 : f32 to vector<1x32xf32>
    %361 = arith.addf %357, %360 : vector<1x32xf32>
    %362 = math.rsqrt %361 : vector<1x32xf32>
    %363 = vector.broadcast %362 : vector<1x32xf32> to vector<8x32xf32>
    %364 = arith.mulf %359, %363 : vector<8x32xf32>
    %365 = vector.broadcast %35 : vector<1x32xf32> to vector<8x32xf32>
    %366 = arith.mulf %364, %365 : vector<8x32xf32>
    %367 = vector.broadcast %36 : vector<1x32xf32> to vector<8x32xf32>
    %368 = arith.addf %366, %367 : vector<8x32xf32>
    %cst_142 = arith.constant 0.000000e+00 : f32
    %369 = vector.broadcast %cst_142 : f32 to vector<8x32xf32>
    %370 = arith.maximumf %368, %369 : vector<8x32xf32>
    %cst_143 = arith.constant dense<0.000000e+00> : vector<32xf32>
    %371 = vector.multi_reduction <add>, %307, %cst_143 [0] : vector<8x32xf32> to vector<32xf32>
    %372 = vector.shape_cast %371 : vector<32xf32> to vector<1x32xf32>
    %cst_144 = arith.constant 8.000000e+00 : f32
    %373 = vector.broadcast %cst_144 : f32 to vector<1x32xf32>
    %374 = arith.divf %372, %373 : vector<1x32xf32>
    %375 = vector.broadcast %374 : vector<1x32xf32> to vector<8x32xf32>
    %376 = arith.subf %307, %375 : vector<8x32xf32>
    %377 = arith.mulf %376, %376 : vector<8x32xf32>
    %cst_145 = arith.constant dense<0.000000e+00> : vector<32xf32>
    %378 = vector.multi_reduction <add>, %377, %cst_145 [0] : vector<8x32xf32> to vector<32xf32>
    %379 = vector.shape_cast %378 : vector<32xf32> to vector<1x32xf32>
    %cst_146 = arith.constant 8.000000e+00 : f32
    %380 = vector.broadcast %cst_146 : f32 to vector<1x32xf32>
    %381 = arith.divf %379, %380 : vector<1x32xf32>
    %382 = vector.broadcast %374 : vector<1x32xf32> to vector<8x32xf32>
    %383 = arith.subf %307, %382 : vector<8x32xf32>
    %cst_147 = arith.constant 9.99999974E-6 : f32
    %384 = vector.broadcast %cst_147 : f32 to vector<1x32xf32>
    %385 = arith.addf %381, %384 : vector<1x32xf32>
    %386 = math.rsqrt %385 : vector<1x32xf32>
    %387 = vector.broadcast %386 : vector<1x32xf32> to vector<8x32xf32>
    %388 = arith.mulf %383, %387 : vector<8x32xf32>
    %389 = vector.broadcast %35 : vector<1x32xf32> to vector<8x32xf32>
    %390 = arith.mulf %388, %389 : vector<8x32xf32>
    %391 = vector.broadcast %36 : vector<1x32xf32> to vector<8x32xf32>
    %392 = arith.addf %390, %391 : vector<8x32xf32>
    %cst_148 = arith.constant 0.000000e+00 : f32
    %393 = vector.broadcast %cst_148 : f32 to vector<8x32xf32>
    %394 = arith.maximumf %392, %393 : vector<8x32xf32>
    %cst_149 = arith.constant dense<0.000000e+00> : vector<32xf32>
    %395 = vector.multi_reduction <add>, %370, %cst_149 [0] : vector<8x32xf32> to vector<32xf32>
    %396 = vector.shape_cast %395 : vector<32xf32> to vector<1x32xf32>
    %cst_150 = arith.constant 8.000000e+00 : f32
    %397 = vector.broadcast %cst_150 : f32 to vector<1x32xf32>
    %398 = arith.divf %396, %397 : vector<1x32xf32>
    %cst_151 = arith.constant dense<0.000000e+00> : vector<32xf32>
    %399 = vector.multi_reduction <add>, %394, %cst_151 [0] : vector<8x32xf32> to vector<32xf32>
    %400 = vector.shape_cast %399 : vector<32xf32> to vector<1x32xf32>
    %cst_152 = arith.constant 8.000000e+00 : f32
    %401 = vector.broadcast %cst_152 : f32 to vector<1x32xf32>
    %402 = arith.divf %400, %401 : vector<1x32xf32>
    %403 = arith.addf %398, %402 : vector<1x32xf32>
    %cst_153 = arith.constant dense<0.000000e+00> : vector<32xf32>
    %404 = vector.multi_reduction <add>, %64, %cst_153 [0] : vector<8x32xf32> to vector<32xf32>
    %405 = vector.shape_cast %404 : vector<32xf32> to vector<1x32xf32>
    %cst_154 = arith.constant 8.000000e+00 : f32
    %406 = vector.broadcast %cst_154 : f32 to vector<1x32xf32>
    %407 = arith.divf %405, %406 : vector<1x32xf32>
    %cst_155 = arith.constant dense<0.000000e+00> : vector<32xf32>
    %408 = vector.multi_reduction <add>, %92, %cst_155 [0] : vector<8x32xf32> to vector<32xf32>
    %409 = vector.shape_cast %408 : vector<32xf32> to vector<1x32xf32>
    %cst_156 = arith.constant 8.000000e+00 : f32
    %410 = vector.broadcast %cst_156 : f32 to vector<1x32xf32>
    %411 = arith.divf %409, %410 : vector<1x32xf32>
    %412 = arith.addf %407, %411 : vector<1x32xf32>
    %c0_157 = arith.constant 0 : index
    %c0_158 = arith.constant 0 : index
    %413 = vector.load %arg9[%c0_157, %c0_158] : memref<32x32xf32, #tpu.memory_space<vmem>>, vector<32x32xf32>
    %cst_159 = arith.constant dense<0.000000e+00> : vector<1x32xf32>
    %414 = tpu.matmul %403, %413, %cst_159 {dimension_numbers = #tpu.dot_dimension_numbers<[1], [0], [0], [1], [0, 0, 1, 1], [], []>} : vector<1x32xf32>, vector<32x32xf32>, vector<1x32xf32> -> vector<1x32xf32>
    %c0_160 = arith.constant 0 : index
    %c0_161 = arith.constant 0 : index
    %415 = vector.load %arg10[%c0_160, %c0_161] : memref<1x32xf32, #tpu.memory_space<vmem>>, vector<1x32xf32>
    %cst_162 = arith.constant 2.000000e+00 : f32
    %416 = vector.broadcast %cst_162 : f32 to vector<1x32xf32>
    %417 = arith.mulf %416, %415 : vector<1x32xf32>
    %418 = arith.addf %414, %417 : vector<1x32xf32>
    %c0_163 = arith.constant 0 : index
    %c0_164 = arith.constant 0 : index
    %419 = vector.load %arg11[%c0_163, %c0_164] : memref<32x32xf32, #tpu.memory_space<vmem>>, vector<32x32xf32>
    %cst_165 = arith.constant dense<0.000000e+00> : vector<1x32xf32>
    %420 = tpu.matmul %412, %419, %cst_165 {dimension_numbers = #tpu.dot_dimension_numbers<[1], [0], [0], [1], [0, 0, 1, 1], [], []>} : vector<1x32xf32>, vector<32x32xf32>, vector<1x32xf32> -> vector<1x32xf32>
    %421 = arith.addf %418, %420 : vector<1x32xf32>
    %c0_166 = arith.constant 0 : index
    %c0_167 = arith.constant 0 : index
    %422 = vector.load %arg12[%c0_166, %c0_167] : memref<1x32xf32, #tpu.memory_space<vmem>>, vector<1x32xf32>
    %cst_168 = arith.constant 2.000000e+00 : f32
    %423 = vector.broadcast %cst_168 : f32 to vector<1x32xf32>
    %424 = arith.mulf %423, %422 : vector<1x32xf32>
    %425 = arith.addf %421, %424 : vector<1x32xf32>
    %426 = arith.addf %425, %27 : vector<1x32xf32>
    %cst_169 = arith.constant 0.000000e+00 : f32
    %427 = vector.broadcast %cst_169 : f32 to vector<1x32xf32>
    %428 = arith.maximumf %426, %427 : vector<1x32xf32>
    %c0_170 = arith.constant 0 : index
    %c0_171 = arith.constant 0 : index
    %429 = vector.load %arg24[%c0_170, %c0_171] : memref<1x32xf32, #tpu.memory_space<vmem>>, vector<1x32xf32>
    tpu.vector_store %arg24[%c0_170, %c0_171], %428 {strides = array<i32>} : memref<1x32xf32, #tpu.memory_space<vmem>>, vector<1x32xf32>,
    %430 = tpu.concatenate %370, %394, %64, %92 in 1 : vector<8x32xf32>, vector<8x32xf32>, vector<8x32xf32>, vector<8x32xf32> -> vector<8x128xf32>
    %c0_172 = arith.constant 0 : index
    %c0_173 = arith.constant 0 : index
    %431 = vector.load %arg23[%c0_172, %c0_173] : memref<8x128xf32, #tpu.memory_space<vmem>>, vector<8x128xf32>
    tpu.vector_store %arg23[%c0_172, %c0_173], %430 {strides = array<i32>} : memref<8x128xf32, #tpu.memory_space<vmem>>, vector<8x128xf32>,
    return
  }
}

</mosaic_0001>

<bundles_post_ra>
// kernel: gated_gcn_forward.1
= control target key start
LH: loop header
LB: loop body
LE: loop exit
PB: predicated region body
PF: predicated region fallthrough
CT: control target
= control target key end

     0   :  { %s3717_s0 = inlined_call_operand.vmem [shape: f32[16,32], index: 0, kind: input, shape index: {}]   ;;  %s3718_s1 = inlined_call_operand.vmem [shape: f32[16,32], index: 1, kind: input, shape index: {}]   ;;  %s3719_s2 = inlined_call_operand.vmem [shape: f32[1,32], index: 2, kind: input, shape index: {}]   ;;  %s3720_s3 = inlined_call_operand.vmem [shape: f32[32,96], index: 3, kind: input, shape index: {}]   ;;  %s3721_s4 = inlined_call_operand.vmem [shape: f32[1,96], index: 4, kind: input, shape index: {}]   ;;  %s3722_s5 = inlined_call_operand.vmem [shape: f32[32,32], index: 5, kind: input, shape index: {}]   ;;  %s3723_s6 = inlined_call_operand.vmem [shape: f32[1,32], index: 6, kind: input, shape index: {}]   ;;  %s3724_s7 = inlined_call_operand.vmem [shape: f32[32,96], index: 7, kind: input, shape index: {}]   ;;  %s3725_s8 = inlined_call_operand.vmem [shape: f32[1,96], index: 8, kind: input, shape index: {}]   ;;  %s3726_s9 = inlined_call_operand.vmem [shape: f32[32,32], index: 9, kind: input, shape index: {}]   ;;  %s3727_s10 = inlined_call_operand.vmem [shape: f32[1,32], index: 10, kind: input, shape index: {}]   ;;  %s3728_s11 = inlined_call_operand.vmem [shape: f32[32,32], index: 11, kind: input, shape index: {}]   ;;  %s3729_s12 = inlined_call_operand.vmem [shape: f32[1,32], index: 12, kind: input, shape index: {}]   ;;  %s3730_s13 = inlined_call_operand.vmem [shape: f32[1,32], index: 13, kind: input, shape index: {}]   ;;  %s3731_s14 = inlined_call_operand.vmem [shape: f32[32,1], index: 14, kind: input, shape index: {}]   ;;  %s3732_s15 = inlined_call_operand.vmem [shape: f32[1,32], index: 15, kind: input, shape index: {}]   ;;  %s3733_s16 = inlined_call_operand.vmem [shape: f32[1,32], index: 16, kind: input, shape index: {}]   ;;  %s3734_s17 = inlined_call_operand.vmem [shape: f32[1,32], index: 17, kind: input, shape index: {}]   ;;  %s3735_s18 = inlined_call_operand.vmem [shape: f32[1,32], index: 18, kind: input, shape index: {}]   ;;  %s3736_s19 = inlined_call_operand.vmem [shape: f32[8,8], index: 19, kind: input, shape index: {}]   ;;  %s3737_s20 = inlined_call_operand.vmem [shape: f32[8,8], index: 20, kind: input, shape index: {}]   ;;  %s3738_s21 = inlined_call_operand.vmem [shape: f32[8,8], index: 21, kind: input, shape index: {}]   ;;  %s3739_s22 = inlined_call_operand.vmem [shape: f32[8,8], index: 22, kind: input, shape index: {}]   ;;  %s3740_s23 = inlined_call_operand.vmem [shape: f32[8,128], index: 23, kind: output, shape index: {0}]   ;;  %s3741_s24 = inlined_call_operand.hbm [shape: f32[1,32], index: 24, kind: output, shape index: {1}]  }
   0x1   :  { %3747 = sst [smem:[#allocation5_spill]] %s3717_s0 }
   0x2   :  { %3748 = sst [smem:[#allocation6_spill]] %s3718_s1 }
   0x3   :  { %3749 = sst [smem:[#allocation7_spill]] %s3719_s2 }
   0x4   :  { %3750 = sst [smem:[#allocation8_spill]] %s3720_s3 }
   0x5   :  { %3751 = sst [smem:[#allocation9_spill]] %s3721_s4 }
   0x6   :  { %3752 = sst [smem:[#allocation10_spill]] %s3722_s5 }
   0x7   :  { %3753 = sst [smem:[#allocation11_spill]] %s3723_s6 }
   0x8   :  { %3754 = sst [smem:[#allocation12_spill]] %s3724_s7 }
   0x9   :  { %3755 = sst [smem:[#allocation13_spill]] %s3725_s8 }
   0xa   :  { %s3756_s27 = sld [smem:[#allocation8_spill]]  ;;  %vm93_vm0 = vcmask 261120  }
   0xb   :  { %s3757_s0 = sld [smem:[#allocation5_spill]] }
   0xc   :  { %s3758_s8 = sld [smem:[#allocation10_spill]] }
  0x10   :  { %v85_v0 = vld [vmem:[%s3756_s27 + $0x18] sm:$0xff]  ;;  %v84_v1 = vld [vmem:[%s3756_s27 + $0x10] sm:$0xff]  ;;  %v83_v3 = vld [vmem:[%s3756_s27 + $0x8] sm:$0xff] }
  0x11   :  { %2846 = vmatprep.subr.mxu0 %v85_v0  ;;  %v77_v2 = vld [vmem:[%s3757_s0] sm:$0xff] }
  0x12   :  { %2847 = vmatpush3.msra.mxu0 %v85_v0  ;;  %2854 = vmatprep.mubr.msk.f32.mxu0 %vm93_vm0, %v77_v2  ;;  %v178_v4 = vld [vmem:[%s3758_s8 + $0x18] sm:$0xff]  ;;  %v177_v5 = vld [vmem:[%s3758_s8 + $0x10] sm:$0xff] }
  0x13   :  { %2848 = vmatprep.subr.mxu0 %v84_v1  ;;  %2857 = vmatprep.subr.mxu1 %v178_v4 }
  0x14   :  { %30 = vsyncpa [#allocation3], 0  ;;  %2849 = vmatpush3.msra.mxu0 %v84_v1  ;;  %v82_v6 = vld [vmem:[%s3756_s27] sm:$0xff]  ;;  %2858 = vmatpush3.msra.mxu1 %v178_v4  ;;  %v176_v7 = vld [vmem:[%s3758_s8 + $0x8] sm:$0xff]  ;;  %v3103_v10 = vmov 0.0   ;;  %s3759_s25 = sld [smem:[#allocation6_spill]]  ;;  %v428_v32 = vlaneseq }
  0x15   :  { %2850 = vmatprep.subr.mxu0 %v83_v3  ;;  %2859 = vmatprep.subr.mxu1 %v177_v5  ;;  %v78_v8 = vld [vmem:[%s3757_s0 + $0x8] sm:$0xff]  ;;  %v175_v9 = vld [vmem:[%s3758_s8] sm:$0xff]  ;;  %s3760_s1 = sld [smem:[#allocation12_spill]]  ;;  %vm3104_vm1 = vmmov 0   ;;  %vm354_vm2 = vcmask 64512   ;;  %s3105_s28 = smov 96  }
  0x16   :  { %2851 = vmatpush3.msra.mxu0 %v83_v3  ;;  %2860 = vmatpush3.msra.mxu1 %v177_v5  ;;  %s3761_s3 = sld [smem:[#allocation7_spill]]  ;;  %v3306_v19 = vld [vmem:[%s3736_s19] sm:$0xff]  ;;  %s3106_s19 = smov 64   ;;  %v429_v33 = vshrl.u32 %v428_v32, 7 }
  0x17   :  { %2852 = vmatprep.subr.mxu0 %v82_v6  ;;  %2861 = vmatprep.subr.mxu1 %v176_v7  ;;  %v3311_v20 = vld [vmem:[%s3737_s20] sm:$0xff]  ;;  %s3762_s8 = sld [smem:[#allocation9_spill]] }
  0x18   :  { %2853 = vmatpush3.msra.mxu0 %v82_v6  ;;  %2862 = vmatpush3.msra.mxu1 %v176_v7  ;;  %v349_v24 = vadd.f32 %v3311_v20, %v3306_v19  ;;  %s3763_s2 = sld [smem:[#allocation11_spill]]  ;;  %v3362_v37 = vsub.s32 0, %v429_v33 }
  0x19   :  { %2855 = vmatmul.mubr.msk.f32.vlgmr.msra.gmra.mxu0 %vm93_vm0, %v78_v8  ;;  %2863 = vmatprep.subr.mxu1 %v175_v9  ;;  %s3764_s7 = sld [smem:[#allocation13_spill]] }
  0x1a   :  { %2868 = vmatprep.subr.mxu0 %v3103_v10  ;;  %v79_v11 = vld [vmem:[%s3759_s25] sm:$0xff]  ;;  %2864 = vmatpush3.msra.mxu1 %v175_v9  ;;  %v80_v13 = vld [vmem:[%s3759_s25 + $0x8] sm:$0xff] }
  0x1b   :  { %v270_v12 = vld [vmem:[%s3760_s1 + $0x18] sm:$0xff]  ;;  %2865 = vmatprep.mubr.msk.f32.mxu1 %vm93_vm0, %v79_v11  ;;  %v269_v14 = vld [vmem:[%s3760_s1 + $0x10] sm:$0xff]  ;;  %2879 = vmatprep.subr.mxu1 %v3103_v10  ;;  %v268_v15 = vld [vmem:[%s3760_s1 + $0x8] sm:$0xff] }
  0x1c   :  { %2869 = vmatpush3.msra.mxu0 %v270_v12  ;;  %2866 = vmatmul.mubr.msk.f32.vlgmr.msra.gmra.mxu1 %vm93_vm0, %v80_v13  ;;  %v267_v16 = vld [vmem:[%s3760_s1] sm:$0xff] }
  0x1d   :  { %2870 = vmatprep.subr.mxu0 %v3103_v10  ;;  %2881 = vmatprep.mubr.msk.f32.mxu1 %vm3104_vm1, %v3103_v10  ;;  %v81_v17 = vld [vmem:[%s3761_s3] sm:$0x1] }
  0x1e   :  { %2871 = vmatpush3.msra.mxu0 %v269_v14  ;;  %2876 = vmatprep.mubr.msk.f32.mxu0 %vm3104_vm1, %v3103_v10  ;;  %v2718_v21 = vld [vmem:[%s3762_s8] ss:$0 sm:$0xff] }
  0x1f   :  { %2872 = vmatprep.subr.mxu0 %v3103_v10  ;;  %v2721_v26 = vld [vmem:[%s3763_s2] ss:$0 sm:$0xff] }
  0x20   :  { %2873 = vmatpush3.msra.mxu0 %v268_v15  ;;  %v271_v35 = vld [vmem:[%s3764_s7] sm:$0x1] }
  0x21   :  { %2874 = vmatprep.subr.mxu0 %v3103_v10 }
  0x22   :  { %2875 = vmatpush3.msra.mxu0 %v267_v16  ;;  %v2726_v16 = vld [vmem:[%s3732_s15] ss:$0 sm:$0xff] }
  0x23   :  { %2877 = vmatmul.mubr.msk.f32.vlgmr.msra.gmra.mxu0 %vm93_vm0, %v81_v17  ;;  %2889 = vmatprep.subr.mxu0 %v3103_v10 }
  0x24   :  { %2891 = vmatprep.mubr.msk.f32.mxu0 %vm3104_vm1, %v3103_v10 }
  0xd9   :  { %v2856_v18 = vpop.f32.mrf.mxu0 }
  0xda   :  { %v3324_v25 = vadd.f32 %v2856_v18, %v2718_v21 }
  0xdb   :  { %v166_v22 = vpop.f32.mrf.mxu0 }
  0xdc   :  { %v3316_v23 = vadd.f32 %v2718_v21, %v166_v22  ;;  %v2867_v27 = vpop.f32.mrf.mxu1  ;;  %v2727_v21 = vld [vmem:[%s3733_s16] ss:$0 sm:$0xff] }
  0xdd   :  { %v264_v28 = vadd.f32 %v2867_v27, %v2721_v26 }
  0xde   :  { %1870 = vrot.lane.b32.xlu1 %v3316_v23, %s3105_s28  ;;  %566 = vrot.lane.b32.xlu0 %v3316_v23, %s3106_s19  ;;  %v258_v34 = vpop.f32.mrf.mxu1 }
  0xdf   :  { %2880 = vmatpush3.msra.mxu1 %v3316_v23  ;;  %v259_v43 = vadd.f32 %v2721_v26, %v258_v34 }
  0xe0   :  { %2884 = vmatprep.subr.mxu1 %v3103_v10  ;;  %2882 = vmatmul.mubr.msk.f32.vlgmr.msra.gmra.mxu1 %vm354_vm2, %v349_v24 }
  0xe1   :  { %2885 = vmatpush3.msra.mxu1 %v3324_v25  ;;  %2886 = vmatprep.mubr.msk.f32.mxu1 %vm3104_vm1, %v3103_v10 }
  0xe2   :  { %1796 = vrot.lane.b32.xlu1 %v3324_v25, %s3105_s28  ;;  %1185 = vrot.lane.b32.xlu0 %v3324_v25, %s3106_s19 }
  0xe3   :  { %2894 = vmatprep.subr.mxu1 %v3103_v10  ;;  %v341_v29 = vpop.f32.mrf.mxu0 }
  0xe4   :  { %2887 = vmatmul.mubr.msk.f32.vlgmr.msra.gmra.mxu1 %vm354_vm2, %v349_v24  ;;  %v3360_v36 = vadd.f32 %v341_v29, %v271_v35 }
  0xe5   :  { %2896 = vmatprep.mubr.msk.f32.mxu1 %vm3104_vm1, %v3103_v10  ;;  %v2878_v30 = vpop.f32.mrf.mxu0 }
  0xe6   :  { %v3366_v40 = vrot.slane %v3360_v36, %v3362_v37 }
 0x150   :  { %v3343_v31 = vpop.permute.xlu0 %566 }
 0x151   :  { %2890 = vmatpush3.msra.mxu0 %v3343_v31  ;;  %2895 = vmatpush3.msra.mxu1 %v3343_v31 }
 0x152   :  { %2892 = vmatmul.mubr.msk.f32.vlgmr.msra.gmra.mxu0 %vm354_vm2, %v3306_v19  ;;  %2897 = vmatmul.mubr.msk.f32.vlgmr.msra.gmra.mxu1 %vm354_vm2, %v3311_v20 }
 0x153   :  { %2899 = vmatprep.subr.mxu0 %v3103_v10  ;;  %2904 = vmatprep.subr.mxu1 %v3103_v10 }
 0x154   :  { %2901 = vmatprep.mubr.msk.f32.mxu0 %vm3104_vm1, %v3103_v10  ;;  %2906 = vmatprep.mubr.msk.f32.mxu1 %vm3104_vm1, %v3103_v10 }
 0x1a0   :  { %v424_v38 = vpop.f32.mrf.mxu1 }
 0x1a1   :  { %v425_v47 = vadd.f32 %v424_v38, %v259_v43 }
 0x1a2   :  { %v2883_v39 = vpop.f32.mrf.mxu1 }
 0x1a3   :  { %v432_v50 = vadd.f32 %v3366_v40, %v425_v47  ;;  %v3385_v39 = vld [vmem:[%s3738_s21] sm:$0xff] }
 0x1a4   :  { %v536_v41 = vpop.f32.mrf.mxu1 }
 0x1a5   :  { %v537_v42 = vadd.f32 %v536_v41, %v264_v28  ;;  %v433_v53 = vsel %vm93_vm0, %v432_v50, 0.0 }
 0x1a6   :  { %v2888_v44 = vpop.f32.mrf.mxu1  ;;  %v434_v56 = vrot.slane %v433_v53, 4 }
 0x1a7   :  { %v540_v45 = vadd.f32 %v537_v42, %v3366_v40 }
 0x1a8   :  { %v435_v59 = vadd.f32 %v434_v56, %v433_v53 }
 0x1a9   :  { %v541_v46 = vsel %vm93_vm0, %v540_v45, 0.0 }
 0x1aa   :  { %v542_v48 = vrot.slane %v541_v46, 4  ;;  %v436_v62 = vrot.slane %v435_v59, 2 }
 0x1ac   :  { %v543_v49 = vadd.f32 %v542_v48, %v541_v46  ;;  %v437_v1 = vadd.f32 %v436_v62, %v435_v59  ;;  %v3396_v46 = vld [vmem:[%s3739_s22] sm:$0xff]  ;;  %v3418_v48 = vpop.permute.xlu0 %1185 }
 0x1ae   :  { %v544_v51 = vrot.slane %v543_v49, 2  ;;  %v438_v4 = vrot.slane %v437_v1, 1 }
 0x1b0   :  { %v545_v52 = vadd.f32 %v544_v51, %v543_v49  ;;  %v439_v7 = vadd.f32 %v438_v4, %v437_v1  ;;  %v1794_v4 = vld [vmem:[%s3731_s14 + $0x10] sm:$0xff] }
 0x1b2   :  { %v546_v54 = vrot.slane %v545_v52, 1  ;;  %v441_v11 = vmul.f32 0.125, %v439_v7 }
 0x1b4   :  { %v547_v55 = vadd.f32 %v546_v54, %v545_v52  ;;  %v442_v12 = vsub.f32 %v432_v50, %v441_v11 }
 0x1b6   :  { %v548_v57 = vmul.f32 0.125, %v547_v55  ;;  %v443_v13 = vmul.f32 %v442_v12, %v442_v12 }
 0x1b8   :  { %v549_v58 = vsub.f32 %v540_v45, %v548_v57  ;;  %v444_v14 = vsel %vm93_vm0, %v443_v13, 0.0 }
 0x1b9   :  { %v445_v18 = vrot.slane %v444_v14, 4 }
 0x1ba   :  { %v550_v60 = vmul.f32 %v549_v58, %v549_v58 }
 0x1bb   :  { %v446_v26 = vadd.f32 %v445_v18, %v444_v14 }
 0x1bc   :  { %v551_v61 = vsel %vm93_vm0, %v550_v60, 0.0 }
 0x1bd   :  { %v552_v63 = vrot.slane %v551_v61, 4  ;;  %v447_v27 = vrot.slane %v446_v26, 2 }
 0x1bf   :  { %v553_v0 = vadd.f32 %v552_v63, %v551_v61  ;;  %v448_v28 = vadd.f32 %v447_v27, %v446_v26 }
 0x1c1   :  { %v554_v2 = vrot.slane %v553_v0, 2  ;;  %v449_v29 = vrot.slane %v448_v28, 1 }
 0x1c3   :  { %v555_v3 = vadd.f32 %v554_v2, %v553_v0  ;;  %v450_v30 = vadd.f32 %v449_v29, %v448_v28  ;;  %v1795_v2 = vld [vmem:[%s3731_s14 + $0x18] sm:$0xff] }
 0x1c5   :  { %v556_v5 = vrot.slane %v555_v3, 1  ;;  %v451_v32 = vmul.f32 0.125, %v450_v30 }
 0x1c7   :  { %v557_v6 = vadd.f32 %v556_v5, %v555_v3  ;;  %v452_v33 = vadd.f32 1e-05, %v451_v32  ;;  %v1871_v3 = vpop.permute.xlu1 %1870 }
 0x1c9   :  { %v558_v8 = vmul.f32 0.125, %v557_v6  ;;  %v1791_v6 = vld [vmem:[%s3730_s13] sm:$0x1] }
 0x1cb   :  { %v559_v9 = vadd.f32 1e-05, %v558_v8  ;;  %v1797_v13 = vpop.permute.xlu1 %1796 }
 0x1cd   :  { %3041 = vrsqrt.f32 %v559_v9  ;;  %v1793_v9 = vld [vmem:[%s3731_s14 + $0x8] sm:$0xff] }
 0x1ce   :  { %3043 = vrsqrt.f32 %v452_v33 }
 0x1da   :  { %v3042_v15 = vpop.eup %3041 }
 0x1db   :  { %v561_v17 = vmul.f32 %v3042_v15, %v549_v58  ;;  %v3044_v34 = vpop.eup %3043 }
 0x1dc   :  { %v454_v35 = vmul.f32 %v3044_v34, %v442_v12  ;;  %v1792_v12 = vld [vmem:[%s3731_s14] sm:$0xff]  ;;  %s3108_s14 = smov 32  }
 0x1dd   :  { %v562_v22 = vmul.f32 %v2726_v16, %v561_v17  ;;  %v3107_v17 = vmov 0  }
 0x1de   :  { %v461_v38 = vmul.f32 %v2726_v16, %v454_v35  ;;  %3040 = vset.pattern.permute.xlu0 %v3107_v17 }
 0x1df   :  { %v3380_v24 = vadd.f32 %v2727_v21, %v562_v22 }
 0x1e0   :  { %v468_v44 = vadd.f32 %v2727_v21, %v461_v38 }
 0x1e1   :  { %v3461_v1 = vmax.f32 %v3380_v24, 0.0 }
 0x1e2   :  { %v3404_v47 = vmax.f32 %v468_v44, 0.0 }
 0x212   :  { %v638_v41 = vpop.f32.mrf.mxu0  ;;  %v711_v42 = vpop.f32.mrf.mxu1 }
 0x213   :  { %2900 = vmatpush3.msra.mxu0 %v638_v41  ;;  %2905 = vmatpush3.msra.mxu1 %v711_v42 }
 0x214   :  { %v2898_v43 = vpop.f32.mrf.mxu1  ;;  %2902 = vmatmul.mubr.msk.f32.vlgmr.msra.gmra.mxu0 %vm354_vm2, %v3385_v39  ;;  %2907 = vmatmul.mubr.msk.f32.vlgmr.msra.gmra.mxu1 %vm354_vm2, %v3385_v39  ;;  %v2893_v45 = vpop.f32.mrf.mxu0 }
 0x215   :  { %2914 = vmatprep.subr.mxu1 %v3103_v10  ;;  %2909 = vmatprep.subr.mxu0 %v3103_v10 }
 0x216   :  { %2915 = vmatpush3.msra.mxu1 %v711_v42  ;;  %2910 = vmatpush3.msra.mxu0 %v638_v41 }
 0x217   :  { %2911 = vmatprep.mubr.msk.f32.mxu0 %vm3104_vm1, %v3103_v10  ;;  %2916 = vmatprep.mubr.msk.f32.mxu1 %vm3104_vm1, %v3103_v10 }
 0x218   :  { %2919 = vmatprep.subr.mxu0 %v3103_v10  ;;  %2924 = vmatprep.subr.mxu1 %v3103_v10 }
 0x219   :  { %2912 = vmatmul.mubr.msk.f32.vlgmr.msra.gmra.mxu0 %vm354_vm2, %v3396_v46  ;;  %2917 = vmatmul.mubr.msk.f32.vlgmr.msra.gmra.mxu1 %vm354_vm2, %v3396_v46 }
 0x21a   :  { %2920 = vmatpush3.msra.mxu0 %v3404_v47  ;;  %2925 = vmatpush3.msra.mxu1 %v3404_v47 }
 0x21b   :  { %2921 = vmatprep.mubr.msk.f32.mxu0 %vm3104_vm1, %v3103_v10  ;;  %2926 = vmatprep.mubr.msk.f32.mxu1 %vm3104_vm1, %v3103_v10 }
 0x21c   :  { %2929 = vmatprep.subr.mxu0 %v3103_v10  ;;  %2934 = vmatprep.subr.mxu1 %v3103_v10 }
 0x21d   :  { %2922 = vmatmul.mubr.msk.f32.vlgmr.msra.gmra.mxu0 %vm354_vm2, %v3385_v39  ;;  %2927 = vmatmul.mubr.msk.f32.vlgmr.msra.gmra.mxu1 %vm354_vm2, %v3396_v46 }
 0x21e   :  { %2930 = vmatpush3.msra.mxu0 %v3418_v48  ;;  %2935 = vmatpush3.msra.mxu1 %v3418_v48 }
 0x21f   :  { %2931 = vmatprep.mubr.msk.f32.mxu0 %vm3104_vm1, %v3103_v10  ;;  %2936 = vmatprep.mubr.msk.f32.mxu1 %vm3104_vm1, %v3103_v10 }
 0x220   :  { %2939 = vmatprep.subr.mxu0 %v3103_v10  ;;  %2944 = vmatprep.subr.mxu1 %v3103_v10 }
 0x221   :  { %2932 = vmatmul.mubr.msk.f32.vlgmr.msra.gmra.mxu0 %vm354_vm2, %v3306_v19  ;;  %2937 = vmatmul.mubr.msk.f32.vlgmr.msra.gmra.mxu1 %vm354_vm2, %v3311_v20 }
 0x222   :  { %2941 = vmatprep.mubr.msk.f32.mxu0 %vm3104_vm1, %v3103_v10  ;;  %2946 = vmatprep.mubr.msk.f32.mxu1 %vm3104_vm1, %v3103_v10 }
 0x2d4   :  { %v3440_v49 = vpop.f32.mrf.mxu0  ;;  %v3442_v50 = vpop.f32.mrf.mxu1 }
 0x2d5   :  { %vm1141_vm13 = vcmp.ne.f32.partialorder %v3440_v49, %v3343_v31 }
 0x2d6   :  { %v2903_v51 = vpop.f32.mrf.mxu0  ;;  %v2908_v52 = vpop.f32.mrf.mxu1 }
 0x2d9   :  { %v3444_v53 = vpop.f32.mrf.mxu0  ;;  %v3446_v54 = vpop.f32.mrf.mxu1 }
 0x2da   :  { %vm1150_vm14 = vcmp.ne.f32.partialorder %v3444_v53, %v3343_v31 }
 0x2db   :  { %v2913_v19 = vpop.f32.mrf.mxu0  ;;  %v2918_v55 = vpop.f32.mrf.mxu1 }
 0x2dd   :  { %v1067_v56 = vpop.f32.mrf.mxu0  ;;  %v1137_v20 = vpop.f32.mrf.mxu1 }
 0x2de   :  { %v2737_v57 = vmul.f32 -1.442695, %v1067_v56  ;;  %v2738_v58 = vmul.f32 -1.442695, %v1137_v20 }
 0x2df   :  { %v2923_v59 = vpop.f32.mrf.mxu0  ;;  %v2928_v60 = vpop.f32.mrf.mxu1 }
 0x2e0   :  { %3045 = vpow2.f32 %v2737_v57 }
 0x2e1   :  { %3047 = vpow2.f32 %v2738_v58  ;;  %v1254_v61 = vpop.f32.mrf.mxu0  ;;  %v1324_v62 = vpop.f32.mrf.mxu1 }
 0x2e2   :  { %2940 = vmatpush3.msra.mxu0 %v1254_v61  ;;  %2945 = vmatpush3.msra.mxu1 %v1324_v62 }
 0x2e3   :  { %v2938_v63 = vpop.f32.mrf.mxu1  ;;  %2942 = vmatmul.mubr.msk.f32.vlgmr.msra.gmra.mxu0 %vm354_vm2, %v3385_v39  ;;  %2947 = vmatmul.mubr.msk.f32.vlgmr.msra.gmra.mxu1 %vm354_vm2, %v3385_v39  ;;  %v2933_v0 = vpop.f32.mrf.mxu0 }
 0x2e4   :  { %2954 = vmatprep.subr.mxu1 %v3103_v10  ;;  %2949 = vmatprep.subr.mxu0 %v3103_v10 }
 0x2e5   :  { %2955 = vmatpush3.msra.mxu1 %v1324_v62  ;;  %2950 = vmatpush3.msra.mxu0 %v1254_v61 }
 0x2e6   :  { %2951 = vmatprep.mubr.msk.f32.mxu0 %vm3104_vm1, %v3103_v10  ;;  %2956 = vmatprep.mubr.msk.f32.mxu1 %vm3104_vm1, %v3103_v10 }
 0x2e7   :  { %2959 = vmatprep.subr.mxu0 %v3103_v10  ;;  %2964 = vmatprep.subr.mxu1 %v3103_v10 }
 0x2e8   :  { %2952 = vmatmul.mubr.msk.f32.vlgmr.msra.gmra.mxu0 %vm354_vm2, %v3396_v46  ;;  %2957 = vmatmul.mubr.msk.f32.vlgmr.msra.gmra.mxu1 %vm354_vm2, %v3396_v46 }
 0x2e9   :  { %2960 = vmatpush3.msra.mxu0 %v3461_v1  ;;  %2965 = vmatpush3.msra.mxu1 %v3461_v1 }
 0x2ea   :  { %2961 = vmatprep.mubr.msk.f32.mxu0 %vm3104_vm1, %v3103_v10  ;;  %2966 = vmatprep.mubr.msk.f32.mxu1 %vm3104_vm1, %v3103_v10 }
 0x2eb   :  { %2969 = vmatprep.subr.mxu0 %v3103_v10  ;;  %2980 = vmatprep.subr.mxu1 %v3103_v10 }
 0x2ec   :  { %2962 = vmatmul.mubr.msk.f32.vlgmr.msra.gmra.mxu0 %vm354_vm2, %v3385_v39  ;;  %2967 = vmatmul.mubr.msk.f32.vlgmr.msra.gmra.mxu1 %vm354_vm2, %v3396_v46 }
 0x2ed   :  { %v3046_v5 = vpop.eup %3045  ;;  %2970 = vmatpush3.msra.mxu0 %v1795_v2  ;;  %2981 = vmatpush3.xpose.msk.msra.mxu1 %vm93_vm0, %v1871_v3 }
 0x2ee   :  { %v3048_v7 = vpop.eup %3047  ;;  %v1162_v8 = vadd.f32 1.0, %v3046_v5  ;;  %2971 = vmatprep.subr.mxu0 %v3103_v10  ;;  %2982 = vmatprep.mubr.msk.f32.mxu1 %vm3104_vm1, %v3103_v10 }
 0x2ef   :  { %v1168_v11 = vadd.f32 1.0, %v3048_v7  ;;  %2972 = vmatpush3.msra.mxu0 %v1794_v4  ;;  %2985 = vmatprep.subr.mxu1 %v3103_v10 }
 0x2f0   :  { %3049 = vrcp.f32 %v1162_v8  ;;  %2973 = vmatprep.subr.mxu0 %v3103_v10  ;;  %2983 = vmatmul.mubr.msk.f32.vlgmr.msra.gmra.mxu1 %vm93_vm0, %v1791_v6 }
 0x2f1   :  { %3051 = vrcp.f32 %v1168_v11  ;;  %2974 = vmatpush3.msra.mxu0 %v1793_v9  ;;  %2986 = vmatpush3.msra.mxu1 %v1795_v2 }
 0x2f2   :  { %2975 = vmatprep.subr.mxu0 %v3103_v10  ;;  %2987 = vmatprep.subr.mxu1 %v3103_v10 }
 0x2f3   :  { %2976 = vmatpush3.msra.mxu0 %v1792_v12  ;;  %2977 = vmatprep.mubr.msk.f32.mxu0 %vm3104_vm1, %v3103_v10 }
 0x2f4   :  { %2988 = vmatpush3.msra.mxu1 %v1794_v4  ;;  %2978 = vmatmul.mubr.msk.f32.vlgmr.msra.gmra.mxu0 %vm93_vm0, %v1797_v13 }
 0x2f5   :  { %2989 = vmatprep.subr.mxu1 %v3103_v10  ;;  %2996 = vmatprep.subr.mxu0 %v3103_v10 }
 0x2f6   :  { %2990 = vmatpush3.msra.mxu1 %v1793_v9  ;;  %2997 = vmatpush3.xpose.msk.msra.mxu0 %vm93_vm0, %v1797_v13 }
 0x2f7   :  { %2991 = vmatprep.subr.mxu1 %v3103_v10  ;;  %2993 = vmatprep.mubr.msk.f32.mxu1 %vm3104_vm1, %v3103_v10 }
 0x2f8   :  { %2992 = vmatpush3.msra.mxu1 %v1792_v12  ;;  %2998 = vmatprep.mubr.msk.f32.mxu0 %vm3104_vm1, %v3103_v10 }
 0x2f9   :  { %2994 = vmatmul.mubr.msk.f32.vlgmr.msra.gmra.mxu1 %vm93_vm0, %v1871_v3  ;;  %3001 = vmatprep.subr.mxu0 %v3103_v10 }
 0x2fa   :  { %3006 = vmatprep.subr.mxu1 %v3103_v10  ;;  %2999 = vmatmul.mubr.msk.f32.vlgmr.msra.gmra.mxu0 %vm93_vm0, %v1791_v6 }
 0x2fb   :  { %3002 = vmatpush3.msra.mxu0 %v1871_v3  ;;  %3007 = vmatpush3.msra.mxu1 %v1797_v13 }
 0x2fc   :  { %3003 = vmatprep.mubr.msk.f32.mxu0 %vm3104_vm1, %v3103_v10  ;;  %3008 = vmatprep.mubr.msk.f32.mxu1 %vm3104_vm1, %v3103_v10 }
 0x2fd   :  { %v3522_v14 = vpop.eup %3049  ;;  %3022 = vmatprep.subr.mxu1 %v3103_v10  ;;  %3011 = vmatprep.subr.mxu0 %v3103_v10 }
 0x2fe   :  { %v3526_v15 = vpop.eup %3051 }
 0x2ff   :  { %v3530_v16 = vadd.f32 %v3526_v15, %v3522_v14 }
 0x3a3   :  { %v3532_v18 = vpop.f32.mrf.mxu0  ;;  %v3534_v21 = vpop.f32.mrf.mxu1 }
 0x3a4   :  { %vm1748_vm15 = vcmp.ne.f32.partialorder %v3532_v18, %v3418_v48 }
 0x3a5   :  { %v2943_v22 = vpop.f32.mrf.mxu0  ;;  %v2948_v24 = vpop.f32.mrf.mxu1 }
 0x3a8   :  { %v3536_v26 = vpop.f32.mrf.mxu0  ;;  %v3538_v27 = vpop.f32.mrf.mxu1 }
 0x3aa   :  { %v2958_v28 = vpop.f32.mrf.mxu1  ;;  %v2953_v29 = vpop.f32.mrf.mxu0 }
 0x3ac   :  { %v1744_v30 = vpop.f32.mrf.mxu1  ;;  %v1674_v32 = vpop.f32.mrf.mxu0 }
 0x3ad   :  { %v2748_v33 = vmul.f32 -1.442695, %v1744_v30  ;;  %v2747_v34 = vmul.f32 -1.442695, %v1674_v32 }
 0x3ae   :  { %v2968_v35 = vpop.f32.mrf.mxu1  ;;  %v2963_v38 = vpop.f32.mrf.mxu0 }
 0x3af   :  { %3053 = vpow2.f32 %v2748_v33 }
 0x3b0   :  { %3055 = vpow2.f32 %v2747_v34  ;;  %v3540_v39 = vpop.f32.mrf.mxu1 }
 0x3b2   :  { %v2984_v41 = vpop.f32.mrf.mxu1 }
 0x3b4   :  { %v1866_v42 = vpop.f32.mrf.mxu0 }
 0x3b6   :  { %v2979_v43 = vpop.f32.mrf.mxu0 }
 0x3b9   :  { %v2026_v44 = vpop.f32.mrf.mxu1 }
 0x3ba   :  { %2102 = vperm.xlu0 %3040, %v2026_v44   ;;  %v2096_v45 = vpop.f32.mrf.mxu0 }
 0x3bb   :  { %v2995_v46 = vpop.f32.mrf.mxu1  ;;  %v2108_v59 = vrot.slane %v2096_v45, %v3362_v37 }
 0x3bc   :  { %v3054_v51 = vpop.eup %3053  ;;  %v3000_v52 = vpop.f32.mrf.mxu0 }
 0x3bd   :  { %v3056_v19 = vpop.eup %3055  ;;  %v1775_v55 = vadd.f32 1.0, %v3054_v51 }
 0x3be   :  { %v1769_v56 = vadd.f32 1.0, %v3056_v19 }
 0x3bf   :  { %3057 = vrcp.f32 %v1775_v55 }
 0x3c0   :  { %3059 = vrcp.f32 %v1769_v56  ;;  %v1955_v56 = vrot.slane %v3540_v39, %v3362_v37 }
 0x3cc   :  { %v3542_v20 = vpop.eup %3057 }
 0x3cd   :  { %v3544_v57 = vpop.eup %3059 }
 0x3ce   :  { %v3548_v58 = vadd.f32 %v3544_v57, %v3542_v20 }
 0x435   :  { %v2103_v60 = vpop.permute.xlu0 %2102 }
 0x436   :  { %v2109_v61 = vadd.f32 %v2108_v59, %v2103_v60 }
 0x438   :  { %vm2110_vm3 = vcmp.ge.f32.partialorder %v2109_v61, 0.0  ;;  %v2111_v62 = vmul.f32 0.01, %v2109_v61 }
 0x43a   :  { %v3551_v63 = vsel %vm2110_vm3, %v2109_v61, %v2111_v62  ;;  %vm1757_vm3 = vcmp.ne.f32.partialorder %v3536_v26, %v3418_v48 }
 0x43b   :  { %v2113_v0 = vsel %vm354_vm2, %v3551_v63, -inf  ;;  %v1758_v31 = vsel %vm1757_vm3, 1.0, %v3103_v10 }
 0x43c   :  { %2114 = vmax.xlane.f32.xlu1 %v2113_v0 }
 0x4c5   :  { %v2115_v2 = vpop.xlane.xlu1 %2114 }
 0x4c6   :  { %v2116_v3 = vrot.slane %v2115_v2, 4  ;;  %v2302_v37 = vsub.f32 %v3551_v63, %v2115_v2 }
 0x4c8   :  { %v2117_v4 = vmax.f32 %v2115_v2, %v2116_v3 }
 0x4ca   :  { %v2118_v5 = vrot.slane %v2117_v4, 2 }
 0x4cc   :  { %v2119_v6 = vmax.f32 %v2117_v4, %v2118_v5 }
 0x4ce   :  { %v2120_v7 = vrot.slane %v2119_v6, 1 }
 0x4d0   :  { %v2121_v8 = vmax.f32 %v2119_v6, %v2120_v7 }
 0x4d2   :  { %vm2122_vm4 = vcmp.ge.f32.partialorder %v3551_v63, %v2121_v8 }
 0x4d3   :  { %v2123_v9 = vsel %vm2122_vm4, -inf, %v3551_v63 }
 0x4d4   :  { %v2124_v11 = vsel %vm354_vm2, %v2123_v9, -inf }
 0x4d5   :  { %2125 = vmax.xlane.f32.xlu0 %v2124_v11 }
 0x55e   :  { %v2126_v12 = vpop.xlane.xlu0 %2125 }
 0x55f   :  { %v2127_v13 = vrot.slane %v2126_v12, 4 }
 0x561   :  { %v2128_v17 = vmax.f32 %v2126_v12, %v2127_v13  ;;  %v2303_v13 = vmul.f32 1.442695, %v2302_v37 }
 0x563   :  { %v2129_v22 = vrot.slane %v2128_v17, 2 }
 0x565   :  { %v2130_v24 = vmax.f32 %v2128_v17, %v2129_v22 }
 0x567   :  { %v2131_v28 = vrot.slane %v2130_v24, 1 }
 0x569   :  { %v2132_v29 = vmax.f32 %v2130_v24, %v2131_v28 }
 0x56b   :  { %vm2133_vm5 = vcmp.ge.f32.partialorder %v2123_v9, %v2132_v29 }
 0x56c   :  { %v2134_v30 = vsel %vm2133_vm5, -inf, %v2123_v9 }
 0x56d   :  { %v2135_v32 = vsel %vm354_vm2, %v2134_v30, -inf }
 0x56e   :  { %2136 = vmax.xlane.f32.xlu1 %v2135_v32 }
 0x5f7   :  { %v2137_v33 = vpop.xlane.xlu1 %2136 }
 0x5f8   :  { %v2138_v34 = vrot.slane %v2137_v33, 4 }
 0x5fa   :  { %v2139_v35 = vmax.f32 %v2137_v33, %v2138_v34 }
 0x5fc   :  { %v2140_v38 = vrot.slane %v2139_v35, 2 }
 0x5fe   :  { %v2141_v41 = vmax.f32 %v2139_v35, %v2140_v38 }
 0x600   :  { %v2142_v43 = vrot.slane %v2141_v41, 1 }
 0x602   :  { %v2143_v44 = vmax.f32 %v2141_v41, %v2142_v43 }
 0x604   :  { %vm2144_vm6 = vcmp.ge.f32.partialorder %v2134_v30, %v2143_v44 }
 0x605   :  { %v2145_v45 = vsel %vm2144_vm6, -inf, %v2134_v30 }
 0x606   :  { %v2146_v46 = vsel %vm354_vm2, %v2145_v45, -inf }
 0x607   :  { %2147 = vmax.xlane.f32.xlu0 %v2146_v46 }
 0x61d   :  { %1949 = vperm.xlu0 %3040, %v1866_v42  }
 0x690   :  { %v2148_v51 = vpop.xlane.xlu0 %2147 }
 0x691   :  { %v2149_v52 = vrot.slane %v2148_v51, 4 }
 0x693   :  { %v2150_v19 = vmax.f32 %v2148_v51, %v2149_v52 }
 0x695   :  { %v2151_v55 = vrot.slane %v2150_v19, 2 }
 0x697   :  { %v2152_v59 = vmax.f32 %v2150_v19, %v2151_v55 }
 0x698   :  { %v1950_v60 = vpop.permute.xlu0 %1949 }
 0x699   :  { %v2153_v61 = vrot.slane %v2152_v59, 1  ;;  %v1956_v62 = vadd.f32 %v1955_v56, %v1950_v60 }
 0x69b   :  { %v2154_v0 = vmax.f32 %v2152_v59, %v2153_v61  ;;  %v1958_v3 = vmul.f32 0.01, %v1956_v62  ;;  %vm1957_vm8 = vcmp.ge.f32.partialorder %v1956_v62, 0.0 }
 0x69d   :  { %vm2155_vm7 = vcmp.ge.f32.partialorder %v2145_v45, %v2154_v0  ;;  %v1959_v42 = vsel %vm1957_vm8, %v1956_v62, %v1958_v3 }
 0x69e   :  { %v2156_v4 = vsel %vm2155_vm7, -inf, %v2145_v45  ;;  %v2188_v6 = vsel %vm354_vm2, %v1959_v42, -inf }
 0x69f   :  { %v2157_v5 = vsel %vm354_vm2, %v2156_v4, -inf }
 0x6a0   :  { %2158 = vmax.xlane.f32.xlu1 %v2157_v5 }
 0x6a4   :  { %2189 = vmax.xlane.f32.xlu1 %v2188_v6 }
 0x729   :  { %v2159_v7 = vpop.xlane.xlu1 %2158 }
 0x72a   :  { %v2160_v8 = vrot.slane %v2159_v7, 4 }
 0x72c   :  { %v2161_v39 = vmax.f32 %v2159_v7, %v2160_v8 }
 0x72d   :  { %v2190_v9 = vpop.xlane.xlu1 %2189 }
 0x72e   :  { %v2162_v11 = vrot.slane %v2161_v39, 2  ;;  %v2191_v12 = vsub.f32 %v1959_v42, %v2190_v9 }
 0x730   :  { %v2163_v17 = vmax.f32 %v2161_v39, %v2162_v11  ;;  %v2192_v22 = vmul.f32 1.442695, %v2191_v12  ;;  %v1142_v11 = vsel %vm1141_vm13, 1.0, %v3103_v10 }
 0x731   :  { %v1143_v12 = vsel %vm93_vm0, %v1142_v11, -inf }
 0x732   :  { %v2164_v24 = vrot.slane %v2163_v17, 1  ;;  %3061 = vpow2.f32 %v2192_v22  ;;  %v1749_v22 = vsel %vm1748_vm15, 1.0, %v3103_v10 }
 0x733   :  { %3063 = vpow2.f32 %v2303_v13  ;;  %v1151_v13 = vsel %vm1150_vm14, 1.0, %v3103_v10 }
 0x734   :  { %v2165_v28 = vmax.f32 %v2163_v17, %v2164_v24  ;;  %v1152_v17 = vsel %vm93_vm0, %v1151_v13, -inf  ;;  %v1750_v24 = vsel %vm93_vm0, %v1749_v22, -inf }
 0x736   :  { %vm2166_vm9 = vcmp.ge.f32.partialorder %v2156_v4, %v2165_v28  ;;  %v1759_v28 = vsel %vm93_vm0, %v1758_v31, -inf }
 0x737   :  { %v2167_v29 = vsel %vm2166_vm9, -inf, %v2156_v4 }
 0x738   :  { %v2168_v30 = vsel %vm354_vm2, %v2167_v29, -inf }
 0x739   :  { %2169 = vmax.xlane.f32.xlu1 %v2168_v30 }
 0x73f   :  { %v3062_v32 = vpop.eup %3061 }
 0x740   :  { %v2194_v33 = vsel %vm354_vm2, %v3062_v32, 0.0  ;;  %v3064_v63 = vpop.eup %3063 }
 0x741   :  { %2195 = vadd.xlane.f32.xlu1 %v2194_v33  ;;  %v2305_v2 = vsel %vm354_vm2, %v3064_v63, 0.0 }
 0x745   :  { %2306 = vadd.xlane.f32.xlu1 %v2305_v2 }
 0x7c2   :  { %v2170_v34 = vpop.xlane.xlu1 %2169 }
 0x7c3   :  { %v2171_v35 = vrot.slane %v2170_v34, 4 }
 0x7c5   :  { %v2172_v38 = vmax.f32 %v2170_v34, %v2171_v35 }
 0x7c7   :  { %v2173_v41 = vrot.slane %v2172_v38, 2 }
 0x7c9   :  { %v2174_v43 = vmax.f32 %v2172_v38, %v2173_v41  ;;  %v1779_v38 = vadd.f32 1e-06, %v3548_v58 }
 0x7ca   :  { %v2196_v52 = vpop.xlane.xlu1 %2195 }
 0x7cb   :  { %v2175_v44 = vrot.slane %v2174_v43, 1  ;;  %3065 = vrcp.f32 %v2196_v52 }
 0x7cd   :  { %v2176_v45 = vmax.f32 %v2174_v43, %v2175_v44  ;;  %v2495_v44 = vsel %vm93_vm0, %v3404_v47, 0.0 }
 0x7ce   :  { %v2307_v19 = vpop.xlane.xlu1 %2306 }
 0x7cf   :  { %vm2177_vm10 = vcmp.ge.f32.partialorder %v2167_v29, %v2176_v45  ;;  %3067 = vrcp.f32 %v2307_v19  ;;  %v2503_v45 = vsel %vm93_vm0, %v3461_v1, 0.0 }
 0x7d0   :  { %v2178_v46 = vsel %vm2177_vm10, -inf, %v2167_v29  ;;  %v1172_v29 = vadd.f32 1e-06, %v3530_v16  ;;  %vm2697_vm10 = vcmask 785408  }
 0x7d1   :  { %v2179_v51 = vsel %vm354_vm2, %v2178_v46, -inf }
 0x7d2   :  { %2180 = vmax.xlane.f32.xlu1 %v2179_v51  ;;  %3069 = vrcp.f32 %v1172_v29 }
 0x7d3   :  { %3071 = vrcp.f32 %v1779_v38 }
 0x7d8   :  { %v3066_v61 = vpop.eup %3065 }
 0x7d9   :  { %v2198_v42 = vmul.f32 %v3066_v61, %v3062_v32  ;;  %v2496_v61 = vrot.slane %v2495_v44, 4 }
 0x7dc   :  { %v3068_v0 = vpop.eup %3067 }
 0x7dd   :  { %v2309_v5 = vmul.f32 %v3068_v0, %v3064_v63 }
 0x85b   :  { %v2181_v55 = vpop.xlane.xlu1 %2180 }
 0x85c   :  { %v2182_v56 = vrot.slane %v2181_v55, 4 }
 0x85e   :  { %v2183_v59 = vmax.f32 %v2181_v55, %v2182_v56 }
 0x860   :  { %v2184_v60 = vrot.slane %v2183_v59, 2 }
 0x862   :  { %v2185_v62 = vmax.f32 %v2183_v59, %v2184_v60 }
 0x864   :  { %v2186_v3 = vrot.slane %v2185_v62, 1 }
 0x866   :  { %v2187_v4 = vmax.f32 %v2185_v62, %v2186_v3  ;;  %v2504_v62 = vrot.slane %v2503_v45, 4 }
 0x868   :  { %vm2310_vm11 = vcmp.ge.f32.partialorder %v2309_v5, %v2187_v4  ;;  %vm2199_vm12 = vcmp.ge.f32.partialorder %v2198_v42, %v2187_v4 }
 0x869   :  { %v2758_v6 = vsel %vm2310_vm11, 1.0, %v3103_v10  ;;  %v2755_v7 = vsel %vm2199_vm12, 1.0, %v3103_v10 }
 0x86a   :  { %v3573_v8 = vmul.f32 %v2758_v6, %v2309_v5  ;;  %v3575_v37 = vmul.f32 %v2755_v7, %v2198_v42  ;;  %v2497_v7 = vadd.f32 %v2496_v61, %v2495_v44 }
 0x86c   :  { %v2314_v39 = vsel %vm354_vm2, %v3573_v8, 0.0  ;;  %v2203_v9 = vsel %vm354_vm2, %v3575_v37, 0.0 }
 0x86d   :  { %2315 = vadd.xlane.f32.xlu0 %v2314_v39  ;;  %2204 = vadd.xlane.f32.xlu1 %v2203_v9  ;;  %v2505_v39 = vadd.f32 %v2504_v62, %v2503_v45 }
 0x86f   :  { %v2506_v13 = vrot.slane %v2505_v39, 2 }
 0x871   :  { %1144 = vmax.xlane.f32.xlu1 %v1143_v12  ;;  %v2507_v31 = vadd.f32 %v2506_v13, %v2505_v39 }
 0x875   :  { %1153 = vmax.xlane.f32.xlu1 %v1152_v17 }
 0x879   :  { %1751 = vmax.xlane.f32.xlu1 %v1750_v24 }
 0x87d   :  { %1760 = vmax.xlane.f32.xlu1 %v1759_v28 }
 0x8f6   :  { %v3596_v30 = vpop.xlane.xlu0 %2315  ;;  %v3598_v32 = vpop.xlane.xlu1 %2204 }
 0x8f7   :  { %vm2317_vm4 = vcmp.eq.f32.partialorder %v3596_v30, 0.0  ;;  %vm2206_vm5 = vcmp.eq.f32.partialorder %v3598_v32, 0.0 }
 0x8f8   :  { %v2759_v48 = vsel %vm2317_vm4, 1.0, %v3103_v10  ;;  %v2756_v33 = vsel %vm2206_vm5, 1.0, %v3103_v10 }
 0x8f9   :  { %v2320_v63 = vrot.slane %v2759_v48, 4  ;;  %v2209_v2 = vrot.slane %v2756_v33, 4 }
 0x8fa   :  { %v1145_v16 = vpop.xlane.xlu1 %1144 }
 0x8fb   :  { %v2321_v34 = vmax.f32 %v2759_v48, %v2320_v63  ;;  %v2210_v35 = vmax.f32 %v2756_v33, %v2209_v2  ;;  %vm1146_vm6 = vcmp.gt.f32.partialorder %v1145_v16, 0.0  ;;  %v2593_v2 = vld [vmem:[%s3728_s11] sm:$0xff] }
 0x8fc   :  { %v1149_v46 = vsel %vm1146_vm6, %v3440_v49, %v3442_v50  ;;  %v3070_v50 = vpop.eup %3069 }
 0x8fd   :  { %v2322_v41 = vrot.slane %v2321_v34, 2  ;;  %v2211_v43 = vrot.slane %v2210_v35, 2  ;;  %v1174_v59 = vmul.f32 %v3522_v14, %v1149_v46  ;;  %v3072_v17 = vpop.eup %3071  ;;  %v2762_v46 = vld [vmem:[%s3735_s18] ss:$0 sm:$0xff] }
 0x8fe   :  { %v1154_v51 = vpop.xlane.xlu1 %1153 }
 0x8ff   :  { %v2323_v52 = vmax.f32 %v2321_v34, %v2322_v41  ;;  %v2212_v19 = vmax.f32 %v2210_v35, %v2211_v43  ;;  %vm1155_vm7 = vcmp.gt.f32.partialorder %v1154_v51, 0.0  ;;  %v2761_v43 = vld [vmem:[%s3734_s17] ss:$0 sm:$0xff]  ;;  %v2515_v51 = vld [vmem:[%s3726_s9 + $0x18] sm:$0xff] }
 0x900   :  { %v1158_v55 = vsel %vm1155_vm7, %v3444_v53, %v3446_v54 }
 0x901   :  { %v2324_v58 = vrot.slane %v2323_v52, 1  ;;  %v2213_v56 = vrot.slane %v2212_v19, 1  ;;  %v1175_v60 = vmul.f32 %v3526_v15, %v1158_v55  ;;  %v2512_v55 = vld [vmem:[%s3726_s9] sm:$0xff] }
 0x902   :  { %v1752_v0 = vpop.xlane.xlu1 %1751 }
 0x903   :  { %v2325_v3 = vmax.f32 %v2323_v52, %v2324_v58  ;;  %v2214_v4 = vmax.f32 %v2212_v19, %v2213_v56  ;;  %v1176_v49 = vadd.f32 %v1175_v60, %v1174_v59  ;;  %vm1753_vm8 = vcmp.gt.f32.partialorder %v1752_v0, 0.0  ;;  %v2514_v52 = vld [vmem:[%s3726_s9 + $0x10] sm:$0xff]  ;;  %v2513_v19 = vld [vmem:[%s3726_s9 + $0x8] sm:$0xff] }
 0x904   :  { %v1756_v53 = vsel %vm1753_vm8, %v3532_v18, %v3534_v21  ;;  %v2498_v21 = vrot.slane %v2497_v7, 2 }
 0x905   :  { %v2326_v5 = vmul.f32 1e-10, %v2325_v3  ;;  %v2215_v42 = vmul.f32 1e-10, %v2214_v4  ;;  %v1177_v6 = vmul.f32 %v3070_v50, %v1176_v49  ;;  %v1781_v11 = vmul.f32 %v3544_v57, %v1756_v53  ;;  %v2596_v57 = vld [vmem:[%s3728_s11 + $0x18] sm:$0xff] }
 0x906   :  { %v1761_v54 = vpop.xlane.xlu1 %1760  ;;  %v2499_v24 = vadd.f32 %v2498_v21, %v2497_v7 }
 0x907   :  { %v2327_v14 = vadd.f32 %v2326_v5, %v3596_v30  ;;  %v2216_v15 = vadd.f32 %v2215_v42, %v3598_v32  ;;  %vm1762_vm9 = vcmp.gt.f32.partialorder %v1761_v54, 0.0  ;;  %1179 = vrot.lane.b32.xlu1 %v1177_v6, %s3108_s14 }
 0x908   :  { %v1765_v9 = vsel %vm1762_vm9, %v3536_v26, %v3538_v27  ;;  %v2500_v28 = vrot.slane %v2499_v24, 1  ;;  %v2508_v26 = vrot.slane %v2507_v31, 1 }
 0x909   :  { %3073 = vrcp.f32 %v2327_v14  ;;  %v1782_v12 = vmul.f32 %v3542_v20, %v1765_v9 }
 0x90a   :  { %3075 = vrcp.f32 %v2216_v15  ;;  %v2501_v48 = vadd.f32 %v2500_v28, %v2499_v24  ;;  %v2509_v33 = vadd.f32 %v2508_v26, %v2507_v31 }
 0x90b   :  { %v1783_v18 = vadd.f32 %v1782_v12, %v1781_v11 }
 0x90d   :  { %v1784_v22 = vmul.f32 %v3072_v17, %v1783_v18 }
 0x90f   :  { %1786 = vrot.lane.b32.xlu0 %v1784_v22, %s3108_s14 }
 0x913   :  { %2675 = vrot.lane.b32.xlu0 %v3360_v36, %s3106_s19  ;;  %v2595_v36 = vld [vmem:[%s3728_s11 + $0x10] sm:$0xff] }
 0x916   :  { %v3074_v27 = vpop.eup %3073 }
 0x917   :  { %v3076_v29 = vpop.eup %3075  ;;  %2687 = vrot.lane.b32.xlu0 %v3404_v47, %s3106_s19  ;;  %v2329_v20 = vmul.f32 %v3074_v27, %v3573_v8  ;;  %v2594_v47 = vld [vmem:[%s3728_s11 + $0x8] sm:$0xff]  ;;  %v2502_v8 = vmul.f32 0.125, %v2501_v48 }
 0x918   :  { %v2218_v63 = vmul.f32 %v3076_v29, %v3575_v37  ;;  %v2510_v37 = vmul.f32 0.125, %v2509_v33 }
 0x919   :  { %3009 = vmatmul.mubr.msk.f32.vlgmr.msra.gmra.mxu1 %vm354_vm2, %v2329_v20 }
 0x91a   :  { %3004 = vmatmul.mubr.msk.f32.vlgmr.msra.gmra.mxu0 %vm354_vm2, %v2218_v63  ;;  %3023 = vmatpush3.msra.mxu1 %v2596_v57  ;;  %v2511_v16 = vadd.f32 %v2510_v37, %v2502_v8  ;;  %vm2695_vm2 = vcmask 523264  }
 0x91b   :  { %3024 = vmatprep.subr.mxu1 %v3103_v10  ;;  %3030 = vmatprep.mubr.msk.f32.mxu1 %vm3104_vm1, %v3103_v10 }
 0x91c   :  { %3025 = vmatpush3.msra.mxu1 %v2595_v36  ;;  %3019 = vmatprep.mubr.msk.f32.mxu0 %vm3104_vm1, %v3103_v10  ;;  %vm2413_vm1 = vcmask 523520  }
 0x91d   :  { %3026 = vmatprep.subr.mxu1 %v3103_v10  ;;  %3012 = vmatpush3.msra.mxu0 %v2515_v51 }
 0x91e   :  { %3027 = vmatpush3.msra.mxu1 %v2594_v47  ;;  %3013 = vmatprep.subr.mxu0 %v3103_v10 }
 0x91f   :  { %3028 = vmatprep.subr.mxu1 %v3103_v10  ;;  %3014 = vmatpush3.msra.mxu0 %v2514_v52 }
 0x920   :  { %3029 = vmatpush3.msra.mxu1 %v2593_v2  ;;  %3015 = vmatprep.subr.mxu0 %v3103_v10 }
 0x921   :  { %3031 = vmatmul.mubr.msk.f32.vlgmr.msra.gmra.mxu1 %vm93_vm0, %v2511_v16  ;;  %3016 = vmatpush3.msra.mxu0 %v2513_v19 }
 0x922   :  { %3017 = vmatprep.subr.mxu0 %v3103_v10 }
 0x923   :  { %3018 = vmatpush3.msra.mxu0 %v2512_v55 }
 0x979   :  { %v1180_v59 = vpop.permute.xlu1 %1179 }
 0x97a   :  { %v1182_v60 = vadd.f32 %v1180_v59, %v3316_v23 }
 0x97c   :  { %v1183_v3 = vadd.f32 %v1182_v60, %v3366_v40 }
 0x981   :  { %v1787_v58 = vpop.permute.xlu0 %1786 }
 0x982   :  { %v1789_v56 = vadd.f32 %v1787_v58, %v3324_v25  ;;  %v2410_v25 = vmul.f32 0.8, %v1183_v3 }
 0x984   :  { %v1790_v61 = vadd.f32 %v1789_v56, %v3366_v40 }
 0x986   :  { %v2299_v4 = vmul.f32 0.8, %v1790_v61 }
 0x9d9   :  { %v2400_v34 = vpop.f32.mrf.mxu1 }
 0x9da   :  { %v2289_v35 = vpop.f32.mrf.mxu0 }
 0x9db   :  { %2295 = vrot.lane.b32.xlu1 %v2289_v35, %s3108_s14  ;;  %v3010_v38 = vpop.f32.mrf.mxu1 }
 0x9dc   :  { %v3005_v41 = vpop.f32.mrf.mxu0 }
 0x9df   :  { %2406 = vrot.lane.b32.xlu1 %v2400_v34, %s3108_s14 }
 0x9e1   :  { %v3662_v44 = vpop.f32.mrf.mxu1 }
 0x9e3   :  { %v3032_v45 = vpop.f32.mrf.mxu1  ;;  %2440 = vrot.lane.b32.xlu1 %v2761_v43, %s3108_s14 }
 0x9e7   :  { %2449 = vrot.lane.b32.xlu1 %v2762_v46, %s3108_s14  ;;  %s3109_s14 = smov [#allocation2]  }
 0x9e8   :  { %s2708_s27 = sshll.u32 %s3109_s14, 4  ;;  %s2709_s27 = int_to_ptr.vmem [resolvable:$true] %s2708_s27 }
 0x9e9   :  { %p3086_p1 = scmp.lt.s32.totalorder %s2709_s27, %s2709_s27 }
 0xa4d   :  { %v2296_v62 = vpop.permute.xlu1 %2295 }
 0xa4e   :  { %v2298_v0 = vsel %vm2206_vm5, %v1790_v61, %v2296_v62 }
 0xa4f   :  { %v2300_v49 = vmul.f32 0.2, %v2298_v0 }
 0xa51   :  { %v2301_v50 = vadd.f32 %v2300_v49, %v2299_v4  ;;  %v2407_v10 = vpop.permute.xlu1 %2406 }
 0xa52   :  { %v2409_v5 = vsel %vm2317_vm4, %v1183_v3, %v2407_v10 }
 0xa53   :  { %v2454_v42 = vsel %vm2413_vm1, %v2301_v50, 0.0  ;;  %v2411_v23 = vmul.f32 0.2, %v2409_v5 }
 0xa54   :  { %v2455_v6 = vrot.slane %v2454_v42, 4 }
 0xa55   :  { %v2412_v7 = vadd.f32 %v2411_v23, %v2410_v25  ;;  %v2441_v41 = vpop.permute.xlu1 %2440 }
 0xa56   :  { %v2456_v53 = vadd.f32 %v2455_v6, %v2454_v42 }
 0xa57   :  { %v2414_v32 = vsel %vm2413_vm1, %v2412_v7, 0.0 }
 0xa58   :  { %v2457_v54 = vrot.slane %v2456_v53, 2  ;;  %v2415_v39 = vrot.slane %v2414_v32, 4 }
 0xa59   :  { %v2450_v46 = vpop.permute.xlu1 %2449 }
 0xa5a   :  { %v2458_v40 = vadd.f32 %v2457_v54, %v2456_v53  ;;  %v2416_v14 = vadd.f32 %v2415_v39, %v2414_v32 }
 0xa5c   :  { %v2417_v15 = vrot.slane %v2416_v14, 2  ;;  %v2459_v9 = vrot.slane %v2458_v40, 1 }
 0xa5e   :  { %v2418_v11 = vadd.f32 %v2417_v15, %v2416_v14  ;;  %v2460_v12 = vadd.f32 %v2459_v9, %v2458_v40  ;;  %v2676_v40 = vpop.permute.xlu0 %2675 }
 0xa60   :  { %v2419_v18 = vrot.slane %v2418_v11, 1  ;;  %v2461_v30 = vmul.f32 0.125, %v2460_v12 }
 0xa62   :  { %v2420_v21 = vadd.f32 %v2419_v18, %v2418_v11  ;;  %v2462_v13 = vsub.f32 %v2301_v50, %v2461_v30  ;;  %v2688_v9 = vpop.permute.xlu0 %2687 }
 0xa64   :  { %v2421_v17 = vmul.f32 0.125, %v2420_v21  ;;  %v2463_v22 = vmul.f32 %v2462_v13, %v2462_v13  ;;  %v2671_v21 = vld [vmem:[%s3729_s12] sm:$0x1] }
 0xa66   :  { %v2422_v24 = vsub.f32 %v2412_v7, %v2421_v17  ;;  %v2464_v31 = vsel %vm2413_vm1, %v2463_v22, 0.0  ;;  %v2672_v22 = vmul.f32 2.0, %v2671_v21 }
 0xa67   :  { %v2465_v28 = vrot.slane %v2464_v31, 4 }
 0xa68   :  { %v2423_v26 = vmul.f32 %v2422_v24, %v2422_v24 }
 0xa69   :  { %v2466_v27 = vadd.f32 %v2465_v28, %v2464_v31 }
 0xa6a   :  { %v2424_v29 = vsel %vm2413_vm1, %v2423_v26, 0.0 }
 0xa6b   :  { %v2425_v20 = vrot.slane %v2424_v29, 4  ;;  %v2467_v57 = vrot.slane %v2466_v27, 2 }
 0xa6d   :  { %v2426_v48 = vadd.f32 %v2425_v20, %v2424_v29  ;;  %v2468_v33 = vadd.f32 %v2467_v57, %v2466_v27 }
 0xa6f   :  { %v2427_v63 = vrot.slane %v2426_v48, 2  ;;  %v2469_v36 = vrot.slane %v2468_v33, 1 }
 0xa71   :  { %v2428_v47 = vadd.f32 %v2427_v63, %v2426_v48  ;;  %v2470_v8 = vadd.f32 %v2469_v36, %v2468_v33 }
 0xa73   :  { %v2429_v37 = vrot.slane %v2428_v47, 1  ;;  %v2471_v2 = vmul.f32 0.125, %v2470_v8 }
 0xa75   :  { %v2430_v16 = vadd.f32 %v2429_v37, %v2428_v47  ;;  %v2472_v34 = vadd.f32 1e-05, %v2471_v2 }
 0xa77   :  { %v2431_v35 = vmul.f32 0.125, %v2430_v16  ;;  %3077 = vrsqrt.f32 %v2472_v34 }
 0xa79   :  { %v2432_v38 = vadd.f32 1e-05, %v2431_v35 }
 0xa7b   :  { %3079 = vrsqrt.f32 %v2432_v38 }
 0xa84   :  { %v3078_v43 = vpop.eup %3077 }
 0xa85   :  { %v2474_v45 = vmul.f32 %v3078_v43, %v2462_v13 }
 0xa87   :  { %v2475_v51 = vmul.f32 %v2474_v45, %v2441_v41 }
 0xa88   :  { %v3080_v52 = vpop.eup %3079 }
 0xa89   :  { %v2434_v19 = vmul.f32 %v3080_v52, %v2422_v24  ;;  %v2476_v55 = vadd.f32 %v2475_v51, %v2450_v46 }
 0xa8b   :  { %v2443_v58 = vmul.f32 %v2441_v41, %v2434_v19  ;;  %v2477_v56 = vmax.f32 %v2476_v55, 0.0 }
 0xa8d   :  { %v2452_v59 = vadd.f32 %v2450_v46, %v2443_v58  ;;  %v2486_v60 = vsel %vm2413_vm1, %v2477_v56, 0.0 }
 0xa8e   :  { %v2487_v61 = vrot.slane %v2486_v60, 4 }
 0xa8f   :  { %v2453_v62 = vmax.f32 %v2452_v59, 0.0 }
 0xa90   :  { %v2488_v0 = vadd.f32 %v2487_v61, %v2486_v60 }
 0xa91   :  { %v2478_v3 = vsel %vm2413_vm1, %v2453_v62, 0.0 }
 0xa92   :  { %v2479_v4 = vrot.slane %v2478_v3, 4  ;;  %v2489_v49 = vrot.slane %v2488_v0, 2 }
 0xa94   :  { %v2480_v50 = vadd.f32 %v2479_v4, %v2478_v3  ;;  %v2490_v10 = vadd.f32 %v2489_v49, %v2488_v0 }
 0xa96   :  { %v2481_v5 = vrot.slane %v2480_v50, 2  ;;  %v2491_v25 = vrot.slane %v2490_v10, 1 }
 0xa98   :  { %v2482_v42 = vadd.f32 %v2481_v5, %v2480_v50  ;;  %v2492_v6 = vadd.f32 %v2491_v25, %v2490_v10 }
 0xa9a   :  { %v2483_v23 = vrot.slane %v2482_v42, 1  ;;  %v2493_v32 = vmul.f32 0.125, %v2492_v6 }
 0xa9c   :  { %v2484_v7 = vadd.f32 %v2483_v23, %v2482_v42 }
 0xa9e   :  { %v2485_v53 = vmul.f32 0.125, %v2484_v7 }
 0xaa0   :  { %v2494_v54 = vadd.f32 %v2493_v32, %v2485_v53 }
 0xaa2   :  { %2519 = vrot.lane.b32.xlu1 %v2494_v54, %s3105_s28 }
 0xaa6   :  { %2683 = vrot.lane.b32.xlu1 %v2453_v62, %s3105_s28 }
 0xaaa   :  { %2691 = vrot.lane.b32.xlu1 %v3461_v1, %s3105_s28  ;;  %v2516_v1 = vld [vmem:[%s3727_s10] sm:$0x1]  ;;  %s3081_s10 = scalar_lea.vmem %s2709_s27, 16 }
 0xaab   :  { %v2517_v30 = vmul.f32 2.0, %v2516_v1  ;;  %p3082_p0 = scmp.ne.s32.totalorder %s2709_s27, %s3081_s10 }
 0xb14   :  { %v2520_v39 = vpop.permute.xlu1 %2519 }
 0xb15   :  { %3020 = vmatmul.mubr.msk.f32.vlgmr.msra.gmra.mxu0 %vm93_vm0, %v2520_v39 }
 0xb18   :  { %v2684_v14 = vpop.permute.xlu1 %2683 }
 0xb19   :  { %v2694_v15 = vsel %vm93_vm0, %v2684_v14, %v2477_v56  ;;  %vm2680_vm0 = vcmask 253952  }
 0xb1a   :  { %v2696_v11 = vsel %vm2695_vm2, %v2694_v15, %v2688_v9 }
 0xb1c   :  { %v2692_v12 = vpop.permute.xlu1 %2691 }
 0xb1d   :  { %v2698_v18 = vsel %vm2697_vm10, %v2696_v11, %v2692_v12 }
 0xb1e   :  { %2699 = vst [vmem:[%s3740_s23] sm:$0xff] %v2698_v18  ;;  %s3085_s23 = scalar_lea.vmem %s2709_s27, 32 }
 0xb1f   :  { %p3087_p2 = scmp.lt.s32.totalorder %s3085_s23, %s3081_s10 }
 0xb21   :  { %p3088_p3 = por %p3087_p2, %p3086_p1 }
 0xb23   :  { %p3089_p4 = pnand %p3088_p3, %p3082_p0 }
 0xbd5   :  { %v2589_v13 = vpop.f32.mrf.mxu0 }
 0xbd6   :  { %v2590_v17 = vadd.f32 %v2589_v13, %v2517_v30 }
 0xbd7   :  { %v3021_v24 = vpop.f32.mrf.mxu0 }
 0xbd8   :  { %v2670_v31 = vadd.f32 %v3662_v44, %v2590_v17 }
 0xbda   :  { %v2673_v28 = vadd.f32 %v2672_v22, %v2670_v31 }
 0xbdc   :  { %v2678_v26 = vadd.f32 %v2676_v40, %v2673_v28 }
 0xbde   :  { %v2679_v27 = vmax.f32 %v2678_v26, 0.0 }
 0xbe0   :  { %2681 = vst.msk [vmem:[#allocation2] sm:$0x1] %vm2680_vm0, %v2679_v27 }
 0xbe1   :  { %3092 = shalt.err (!%p3089_p4)
}
 0xbe2   :  { %2711 = dma.vmem_to_hbm [thread:$0]  %s2709_s27, 16, %s3741_s24, [#allocation3]  }
 0xbe3   :  { %3101 = dma.done.wait [#allocation3], 16  }
 0xbe4   :  { %3102 = vsyncadd [#allocation3], 4294967280 }
 0xbe5   :  { %2717 = vsyncpa [#allocation3], 1 }

</bundles_post_ra>
